<compile_context>
chip_gen: v6e
topology: v6e:2x2x1
jax: 0.10.0
libtpu: 0.0.40
codegen_flags: <defaults>
</compile_context>

<pallas_src>
import numpy as np
import jax
import jax.numpy as jnp
from jax import lax
from jax.experimental import pallas as pl
from jax.experimental.pallas import tpu as pltpu

NEG = -1e9            # finite "-inf" for padded tag lanes (exp underflows to 0)
TPAD = 8              # per-CRF padded tag count (lane group size)
TCOMB = 2 * TPAD      # combined (border | tag) tag lanes inside the CRF kernel
HEAD_W = 128          # lane-dense fused head output width
TB = 8                # CRF batch-tile rows per grid step (raise for prod batches)


# ----------------------------------------------------------------------------
# Pallas kernel 1: fused classification head
#   leaky_relu -> (dropout = identity at eval) -> ONE fused bf16 Linear ->
#   grouped log_softmax (lanes [0,8)=border, [8,16)=tag, rest = -1e9 padding).
# Rows of (B*S) are tiled on the grid; each step is a (TM, H) x (H, 128) MXU
# matmul with an unmasked 128-lane output store.
# ----------------------------------------------------------------------------
def _head_kernel(x_ref, w_ref, b_ref, o_ref):
    x = x_ref[...]                                   # (TM, H) f32
    x = jnp.where(x >= 0, x, 0.01 * x)               # F.leaky_relu, slope 0.01
    # nn.Dropout(dropout_rate): identity at inference time.
    # bf16 operands feed the MXU natively; accumulation stays f32.
    z = jnp.dot(x.astype(jnp.bfloat16), w_ref[...],
                preferred_element_type=jnp.float32) + b_ref[...]

    # grouped log_softmax over the two lane groups; padded lanes carry bias
    # NEG so they contribute exactly 0 to every max / sum.
    lane = lax.broadcasted_iota(jnp.int32, z.shape, 1)
    in_b = lane < TPAD
    in_t = (lane >= TPAD) & (lane < TCOMB)
    m_b = jnp.max(jnp.where(in_b, z, NEG), axis=-1, keepdims=True)
    m_t = jnp.max(jnp.where(in_t, z, NEG), axis=-1, keepdims=True)
    m = jnp.where(in_b, m_b, m_t)
    e = jnp.exp(z - m)
    s_b = jnp.sum(jnp.where(in_b, e, 0.0), axis=-1, keepdims=True)
    s_t = jnp.sum(jnp.where(in_t, e, 0.0), axis=-1, keepdims=True)
    o_ref[...] = z - m - jnp.log(jnp.where(in_b, s_b, s_t))   # 128-lane dense store


def head_forward(x2d, w_fused_bf16, b_fused):
    R, H = x2d.shape
    P = w_fused_bf16.shape[1]
    if R >= 512:
        TM = 512                                  # big row tiles for prod shapes
    else:
        TM = ((R + 7) // 8) * 8                   # one tile at demo shapes
    R_pad = ((R + TM - 1) // TM) * TM
    if R_pad != R:
        x2d = jnp.pad(x2d, ((0, R_pad - R), (0, 0)))
    out = pl.pallas_call(
        _head_kernel,
        out_shape=jax.ShapeDtypeStruct((R_pad, P), jnp.float32),
        grid=(R_pad // TM,),
        in_specs=[pl.BlockSpec((TM, H), lambda r: (r, 0)),
                  pl.BlockSpec((H, P), lambda r: (0, 0)),
                  pl.BlockSpec((1, P), lambda r: (0, 0))],
        out_specs=pl.BlockSpec((TM, P), lambda r: (r, 0)),
        compiler_params=pltpu.CompilerParams(dimension_semantics=("parallel",)),
    )(x2d, w_fused_bf16, b_fused)
    return out[:R]


# ----------------------------------------------------------------------------
# Pallas kernel 2: batched CRF log-likelihood for BOTH CRFs, batch-tiled.
# AllenNLP ConditionalRandomField.forward semantics
# (include_start_end_transitions=True).  Combined block-diagonal 16-lane tag
# space: lanes [0,8) = border CRF, [8,16) = tag CRF.  All per-batch-row
# tensors are seq-major (S, TB, ...) so loads are dense 2-D tiles.
# ----------------------------------------------------------------------------
def _crf_kernel(ns_ref, sc_ref, bor_ref, tag_ref, msk_ref, len_ref,
                expT_ref, start_ref, end_ref, tcomb_ref, out_ref):
    S = sc_ref.shape[0]
    g = pl.program_id(0)

    sc = sc_ref[...]                     # (S, TB, 16) log-softmax emissions
    borders = bor_ref[...]               # (S, TB, 1)  int32
    tags = tag_ref[...]                  # (S, TB, 1)  int32
    maskf = msk_ref[...]                 # (S, TB, 1)  f32
    lenv = len_ref[...]                  # (TB, 1)     int32 per-row lengths
    eT = expT_ref[...]                   # (16, 16)    exp(trans), block-diag, 0 off-block
    startC = start_ref[...]              # (1, 1, 16)
    endC = end_ref[...]                  # (1, 1, 16)
    tcomb = tcomb_ref[...]               # (1, 1, 128) both flattened 8x8 transition tables

    def group_sums(v):                   # lane-group sums of a (..., 2*half) tensor
        lane = lax.broadcasted_iota(jnp.int32, v.shape, v.ndim - 1)
        inb = lane < (v.shape[-1] // 2)
        vb = jnp.sum(jnp.where(inb, v, 0.0), axis=-1, keepdims=True)
        vt = jnp.sum(jnp.where(inb, 0.0, v), axis=-1, keepdims=True)
        return vb, vt

    # ---- gold path (numerator), both CRFs in a single lane-dense pass ------
    lane16 = lax.broadcasted_iota(jnp.int32, (1, 1, TCOMB), 2)
    dual16 = ((lane16 == borders) | (lane16 == tags + TPAD)).astype(jnp.float32)

    emit_b, emit_t = group_sums(jnp.sum(sc * dual16 * maskf, axis=0))        # (TB,1)
    start_b, start_t = group_sums(startC[0] * dual16[0])                     # (TB,1)

    end_pos_b, end_pos_t = group_sums(endC * dual16)                         # (S,TB,1)
    # NOTE: assumes a monotone (no-hole) mask, same as AllenNLP.
    is_last = maskf[:-1] * (1.0 - maskf[1:])                                 # (S-1,TB,1)
    end_b = jnp.sum(is_last * end_pos_b[:-1], axis=0) + maskf[S - 1] * end_pos_b[S - 1]
    end_t = jnp.sum(is_last * end_pos_t[:-1], axis=0) + maskf[S - 1] * end_pos_t[S - 1]

    lane128 = lax.broadcasted_iota(jnp.int32, (1, 1, 2 * TPAD * TPAD), 2)
    flat_b = borders[:-1] * TPAD + borders[1:]                               # [0,64)
    flat_t = tags[:-1] * TPAD + tags[1:] + TPAD * TPAD                       # [64,128)
    dual128 = ((lane128 == flat_b) | (lane128 == flat_t)).astype(jnp.float32)
    trans_b, trans_t = group_sums(jnp.sum(tcomb * dual128 * maskf[1:], axis=0))

    num_b = start_b + emit_b + trans_b + end_b                               # (TB,1)
    num_t = start_t + emit_t + trans_t + end_t

    # ---- log-partition: batched forward recursion, alpha stays (TB,16) -----
    lane2 = lax.broadcasted_iota(jnp.int32, (1, TCOMB), 1)
    in_b2 = lane2 < TPAD

    def grouped_max(a):                  # per-group max, broadcast back to lanes
        mb = jnp.max(jnp.where(in_b2, a, NEG), axis=-1, keepdims=True)
        mt = jnp.max(jnp.where(in_b2, NEG, a), axis=-1, keepdims=True)
        return jnp.where(in_b2, mb, mt)

    alpha0 = startC[0] + sc[0]                                               # (TB,16)

    def body(t, alpha):
        em = sc_ref[t]                                       # (TB,16) dense tile read
        m_g = grouped_max(alpha)                             # per-group stabilizer
        p = jnp.exp(alpha - m_g)                             # padded lanes -> 0
        # prev-tag contraction + implicit relayout on the MXU (no eye/transpose):
        s = jnp.dot(p, eT, preferred_element_type=jnp.float32)
        new = m_g + jnp.log(jnp.maximum(s, 1e-30)) + em      # clamp keeps NEG finite
        keep = t < lenv                                      # (TB,1) per-row mask
        return jnp.where(keep, new, alpha)

    nsteps = ns_ref[g]                                       # SMEM: per-tile max length
    alpha = lax.fori_loop(1, nsteps, body, alpha0)

    stops = alpha + endC[0]                                  # (TB,16)
    mb = jnp.max(jnp.where(in_b2, stops, NEG), axis=-1, keepdims=True)
    mt = jnp.max(jnp.where(in_b2, NEG, stops), axis=-1, keepdims=True)
    eb = jnp.exp(jnp.where(in_b2, stops, NEG) - mb)
    et = jnp.exp(jnp.where(in_b2, NEG, stops) - mt)
    part_b = mb + jnp.log(jnp.sum(eb, axis=-1, keepdims=True))
    part_t = mt + jnp.log(jnp.sum(et, axis=-1, keepdims=True))

    out_ref[:, 0:1] = num_b - part_b
    out_ref[:, 1:2] = num_t - part_t


def crf_forward(nsteps_per_tile, sc_sm, bor_sm, tag_sm, msk_sm, len2,
                expT, startC, endC, tcomb):
    S, B_pad, _ = sc_sm.shape
    n_tiles = B_pad // TB
    gs = pltpu.PrefetchScalarGridSpec(
        num_scalar_prefetch=1,
        grid=(n_tiles,),
        in_specs=[pl.BlockSpec((S, TB, TCOMB), lambda g, ns: (0, g, 0)),
                  pl.BlockSpec((S, TB, 1), lambda g, ns: (0, g, 0)),
                  pl.BlockSpec((S, TB, 1), lambda g, ns: (0, g, 0)),
                  pl.BlockSpec((S, TB, 1), lambda g, ns: (0, g, 0)),
                  pl.BlockSpec((TB, 1), lambda g, ns: (g, 0)),
                  pl.BlockSpec((TCOMB, TCOMB), lambda g, ns: (0, 0)),
                  pl.BlockSpec((1, 1, TCOMB), lambda g, ns: (0, 0, 0)),
                  pl.BlockSpec((1, 1, TCOMB), lambda g, ns: (0, 0, 0)),
                  pl.BlockSpec((1, 1, 2 * TPAD * TPAD), lambda g, ns: (0, 0, 0))],
        out_specs=pl.BlockSpec((TB, 2), lambda g, ns: (g, 0)),
    )
    return pl.pallas_call(
        _crf_kernel,
        out_shape=jax.ShapeDtypeStruct((B_pad, 2), jnp.float32),
        grid_spec=gs,
        compiler_params=pltpu.CompilerParams(dimension_semantics=("parallel",)),
    )(nsteps_per_tile, sc_sm, bor_sm, tag_sm, msk_sm, len2,
      expT, startC, endC, tcomb)


# ----------------------------------------------------------------------------
# Full forward (mirrors CascadeNerModel.forward with default flags:
# use_position=False, use_pos_tag=False, use_crf=True).
# ----------------------------------------------------------------------------
def cascade_forward(params, tokens, tags, borders, mask):
    B, S = tokens.shape
    H = params['tok_emb'].shape[1]
    Tb = params['wb'].shape[1]
    Tt = params['wt'].shape[1]

    # TODO(synk): the pretrained XLM-RoBERTa encoder (self.bert) has no
    # in-script equivalent; replaced by a deterministic embedding lookup.
    embedded = params['tok_emb'][tokens]                          # (B, S, H)

    # ---- fused, lane-dense head parameters (weights pre-cast to bf16) -----
    w_f = jnp.zeros((H, HEAD_W), jnp.float32)
    w_f = w_f.at[:, 0:Tb].set(params['wb'])
    w_f = w_f.at[:, TPAD:TPAD + Tt].set(params['wt'])
    w_f = w_f.astype(jnp.bfloat16)
    b_f = jnp.full((1, HEAD_W), NEG, jnp.float32)
    b_f = b_f.at[:, 0:Tb].set(params['bb'])
    b_f = b_f.at[:, TPAD:TPAD + Tt].set(params['bt'])

    scores = head_forward(embedded.reshape(B * S, H), w_f, b_f)   # (B*S, 128)
    scores = scores.reshape(B, S, HEAD_W)
    border_scores = scores[:, :, 0:Tb]
    tag_scores = scores[:, :, TPAD:TPAD + Tt]

    # ---- CRF inputs: compact 16 lanes, seq-major, batch padded to TB ------
    # TODO(synk): head+CRF could be fused into one pallas_call per batch tile
    # to skip this HBM round trip of the scores slab.
    B_pad = ((B + TB - 1) // TB) * TB
    pad_b = B_pad - B
    sc_sm = jnp.pad(jnp.transpose(scores[:, :, :TCOMB], (1, 0, 2)),
                    ((0, 0), (0, pad_b), (0, 0)))                  # (S, B_pad, 16)
    msk_sm = jnp.pad(jnp.transpose(mask.astype(jnp.float32), (1, 0)),
                     ((0, 0), (0, pad_b)))[:, :, None]             # (S, B_pad, 1)
    bor_sm = jnp.pad(jnp.transpose(borders.astype(jnp.int32), (1, 0)),
                     ((0, 0), (0, pad_b)))[:, :, None]
    tag_sm = jnp.pad(jnp.transpose(tags.astype(jnp.int32), (1, 0)),
                     ((0, 0), (0, pad_b)))[:, :, None]
    lengths = jnp.sum(mask.astype(jnp.int32), axis=1)              # (B,)
    len_pad = jnp.pad(lengths, (0, pad_b))
    len2 = len_pad[:, None]                                        # (B_pad, 1)
    n_tiles = B_pad // TB
    nsteps = jnp.max(len_pad.reshape(n_tiles, TB), axis=1).astype(jnp.int32)

    # ---- combined CRF parameters -------------------------------------------
    # exp(transitions) as one block-diagonal 16x16 (zeros off-block / padding):
    # the recursion's prev-tag LSE becomes a single small MXU matmul.
    expT = jnp.zeros((TCOMB, TCOMB), jnp.float32)
    expT = expT.at[0:Tb, 0:Tb].set(jnp.exp(params['border_trans']))
    expT = expT.at[TPAD:TPAD + Tt, TPAD:TPAD + Tt].set(jnp.exp(params['tag_trans']))

    startC = jnp.full((1, 1, TCOMB), NEG, jnp.float32)
    startC = startC.at[0, 0, 0:Tb].set(params['border_start'][0])
    startC = startC.at[0, 0, TPAD:TPAD + Tt].set(params['tag_start'][0])
    endC = jnp.full((1, 1, TCOMB), NEG, jnp.float32)
    endC = endC.at[0, 0, 0:Tb].set(params['border_end'][0])
    endC = endC.at[0, 0, TPAD:TPAD + Tt].set(params['tag_end'][0])

    tb8 = jnp.zeros((TPAD, TPAD), jnp.float32).at[0:Tb, 0:Tb].set(params['border_trans'])
    tt8 = jnp.zeros((TPAD, TPAD), jnp.float32).at[0:Tt, 0:Tt].set(params['tag_trans'])
    tcomb = jnp.concatenate([tb8.reshape(-1), tt8.reshape(-1)]
                            ).reshape(1, 1, 2 * TPAD * TPAD)

    ll = crf_forward(nsteps, sc_sm, bor_sm, tag_sm, msk_sm, len2,
                     expT, startC, endC, tcomb)                    # (B_pad, 2)
    border_loss = -jnp.sum(ll[:B, 0]) / float(B)
    tag_loss = -jnp.sum(ll[:B, 1]) / float(B)
    # TODO(synk): CRF viterbi decoding, span extraction and SpanF1 metric
    # bookkeeping are host-side Python post-processing with no Pallas
    # equivalent.
    return {'border_loss': border_loss, 'tag_loss': tag_loss,
            'border_scores': border_scores, 'tag_scores': tag_scores}


cascade_forward_jit = jax.jit(cascade_forward)


# ----------------------------------------------------------------------------
# Pure-numpy reference (same math, all-f32) for a correctness check.
# ----------------------------------------------------------------------------
def numpy_reference(params, tokens, tags, borders, mask):
    p = {k: np.asarray(v, np.float32) for k, v in params.items()}
    tokens = np.asarray(tokens)
    tags = np.asarray(tags)
    borders = np.asarray(borders)
    m = np.asarray(mask).astype(np.float32)

    x = p['tok_emb'][tokens]
    x = np.where(x >= 0, x, 0.01 * x)

    def log_softmax(z):
        mx = z.max(-1, keepdims=True)
        zs = z - mx
        return zs - np.log(np.exp(zs).sum(-1, keepdims=True))

    bs = log_softmax(x @ p['wb'] + p['bb'])
    ts = log_softmax(x @ p['wt'] + p['bt'])

    def crf_ll(logits, tg, trans, start, end):
        start = start[0]
        end = end[0]
        B, S, T = logits.shape
        out = np.zeros(B, np.float64)
        for b in range(B):
            score = start[tg[b, 0]]
            for i in range(S - 1):
                score += trans[tg[b, i], tg[b, i + 1]] * m[b, i + 1]
                score += logits[b, i, tg[b, i]] * m[b, i]
            last = int(m[b].sum()) - 1
            score += end[tg[b, last]] + logits[b, S - 1, tg[b, last]] * m[b, S - 1]
            alpha = start + logits[b, 0]
            for i in range(1, S):
                inner = alpha[:, None] + trans + logits[b, i][None, :]
                mx = inner.max(axis=0)
                new = mx + np.log(np.exp(inner - mx).sum(axis=0))
                alpha = new * m[b, i] + alpha * (1 - m[b, i])
            stops = alpha + end
            mx = stops.max()
            part = mx + np.log(np.exp(stops - mx).sum())
            out[b] = score - part
        return out

    B = tokens.shape[0]
    border_loss = -crf_ll(bs, borders, p['border_trans'], p['border_start'],
                          p['border_end']).sum() / float(B)
    tag_loss = -crf_ll(ts, tags, p['tag_trans'], p['tag_start'],
                       p['tag_end']).sum() / float(B)
    return bs, ts, border_loss, tag_loss


# ----------------------------------------------------------------------------
if __name__ == "__main__":
    # Small shapes implied by the forward: batch=2, seq=8, hidden=128,
    # 5 BIO tags, derived border vocab {O, B, I} of size 3.
    B, S, H, V = 2, 8, 128, 50
    Tt, Tb = 5, 3

    key = jax.random.PRNGKey(0)
    ks = jax.random.split(key, 16)
    params = {
        'tok_emb': 0.1 * jax.random.normal(ks[0], (V, H), jnp.float32),
        'wb': 0.1 * jax.random.normal(ks[1], (H, Tb), jnp.float32),
        'bb': 0.1 * jax.random.normal(ks[2], (1, Tb), jnp.float32),
        'wt': 0.1 * jax.random.normal(ks[3], (H, Tt), jnp.float32),
        'bt': 0.1 * jax.random.normal(ks[4], (1, Tt), jnp.float32),
        'border_trans': 0.1 * jax.random.normal(ks[5], (Tb, Tb), jnp.float32),
        'border_start': 0.1 * jax.random.normal(ks[6], (1, Tb), jnp.float32),
        'border_end': 0.1 * jax.random.normal(ks[7], (1, Tb), jnp.float32),
        'tag_trans': 0.1 * jax.random.normal(ks[8], (Tt, Tt), jnp.float32),
        'tag_start': 0.1 * jax.random.normal(ks[9], (1, Tt), jnp.float32),
        'tag_end': 0.1 * jax.random.normal(ks[10], (1, Tt), jnp.float32),
    }

    tokens = jax.random.randint(ks[11], (B, S), 0, V, dtype=jnp.int32)
    tags = jax.random.randint(ks[12], (B, S), 0, Tt, dtype=jnp.int32)
    borders = jax.random.randint(ks[13], (B, S), 0, Tb, dtype=jnp.int32)
    lengths = jnp.array([S, 5], dtype=jnp.int32)
    mask = (jnp.arange(S, dtype=jnp.int32)[None, :] < lengths[:, None]).astype(jnp.int32)

    out = cascade_forward_jit(params, tokens, tags, borders, mask)
    out = jax.tree_util.tree_map(jax.block_until_ready, out)

    # Correctness check against the f32 numpy reference (head matmul runs in
    # bf16 on the MXU, so tolerances are slightly looser than pure-f32).
    bs_ref, ts_ref, bl_ref, tl_ref = numpy_reference(params, tokens, tags, borders, mask)
    np.testing.assert_allclose(np.asarray(out['border_scores']), bs_ref, rtol=2e-2, atol=5e-3)
    np.testing.assert_allclose(np.asarray(out['tag_scores']), ts_ref, rtol=2e-2, atol=5e-3)
    np.testing.assert_allclose(float(out['border_loss']), bl_ref, rtol=2e-2, atol=2e-2)
    np.testing.assert_allclose(float(out['tag_loss']), tl_ref, rtol=2e-2, atol=2e-2)

    print("KERNEL_OK")
</pallas_src>

<mosaic_0001>
module attributes {stable_mosaic.version = 11 : i64} {
  func.func @_head_kernel(%arg0: i32, %arg1: memref<16x128xf32, #tpu.memory_space<vmem>>, %arg2: memref<128x128xbf16, #tpu.memory_space<vmem>>, %arg3: memref<1x128xf32, #tpu.memory_space<vmem>>, %arg4: memref<16x128xf32, #tpu.memory_space<vmem>>) attributes {dimension_semantics = [#tpu.dimension_semantics<parallel>], iteration_bounds = array<i64: 1>, scalar_prefetch = 0 : i64, scratch_operands = 0 : i64, tpu.core_type = #tpu.core_type<tc>, window_params = [{transform_indices = @transform_0, window_bounds = array<i64: 16, 128>}, {pipeline_mode = #tpu.pipeline_mode<synchronous>, transform_indices = @transform_1, window_bounds = array<i64: 128, 128>}, {pipeline_mode = #tpu.pipeline_mode<synchronous>, transform_indices = @transform_2, window_bounds = array<i64: 1, 128>}, {transform_indices = @transform_3, window_bounds = array<i64: 16, 128>}]} {
    %c0 = arith.constant 0 : index
    %c0_0 = arith.constant 0 : index
    %0 = vector.load %arg1[%c0, %c0_0] : memref<16x128xf32, #tpu.memory_space<vmem>>, vector<16x128xf32>
    %cst = arith.constant 0.000000e+00 : f32
    %1 = vector.broadcast %cst : f32 to vector<16x128xf32>
    %2 = arith.cmpf oge, %0, %1 : vector<16x128xf32>
    %cst_1 = arith.constant 0.00999999977 : f32
    %3 = vector.broadcast %cst_1 : f32 to vector<16x128xf32>
    %4 = arith.mulf %3, %0 : vector<16x128xf32>
    %5 = arith.select %2, %0, %4 : vector<16x128xi1>, vector<16x128xf32>
    %6 = arith.truncf %5 : vector<16x128xf32> to vector<16x128xbf16>
    %c0_2 = arith.constant 0 : index
    %c0_3 = arith.constant 0 : index
    %7 = vector.load %arg2[%c0_2, %c0_3] : memref<128x128xbf16, #tpu.memory_space<vmem>>, vector<128x128xbf16>
    %cst_4 = arith.constant dense<0.000000e+00> : vector<16x128xf32>
    %8 = tpu.matmul %6, %7, %cst_4 {dimension_numbers = #tpu.dot_dimension_numbers<[1], [0], [0], [1], [0, 0, 1, 1], [], []>} : vector<16x128xbf16>, vector<128x128xbf16>, vector<16x128xf32> -> vector<16x128xf32>
    %c0_5 = arith.constant 0 : index
    %c0_6 = arith.constant 0 : index
    %9 = vector.load %arg3[%c0_5, %c0_6] : memref<1x128xf32, #tpu.memory_space<vmem>>, vector<1x128xf32>
    %10 = vector.broadcast %9 : vector<1x128xf32> to vector<16x128xf32>
    %11 = arith.addf %8, %10 : vector<16x128xf32>
    %12 = tpu.iota {dimensions = array<i32: 1>} : vector<16x128xi32>
    %c8_i32 = arith.constant 8 : i32
    %13 = vector.broadcast %c8_i32 : i32 to vector<16x128xi32>
    %14 = arith.cmpi slt, %12, %13 : vector<16x128xi32>
    %c8_i32_7 = arith.constant 8 : i32
    %15 = vector.broadcast %c8_i32_7 : i32 to vector<16x128xi32>
    %16 = arith.cmpi sge, %12, %15 : vector<16x128xi32>
    %c16_i32 = arith.constant 16 : i32
    %17 = vector.broadcast %c16_i32 : i32 to vector<16x128xi32>
    %18 = arith.cmpi slt, %12, %17 : vector<16x128xi32>
    %19 = arith.andi %16, %18 : vector<16x128xi1>
    %cst_8 = arith.constant -1.000000e+09 : f32
    %20 = vector.broadcast %cst_8 : f32 to vector<16x128xf32>
    %21 = arith.select %14, %11, %20 : vector<16x128xi1>, vector<16x128xf32>
    %cst_9 = arith.constant dense<0xFF800000> : vector<16xf32>
    %22 = vector.multi_reduction <maximumf>, %21, %cst_9 [1] : vector<16x128xf32> to vector<16xf32>
    %23 = vector.shape_cast %22 : vector<16xf32> to vector<16x1xf32>
    %cst_10 = arith.constant -1.000000e+09 : f32
    %24 = vector.broadcast %cst_10 : f32 to vector<16x128xf32>
    %25 = arith.select %19, %11, %24 : vector<16x128xi1>, vector<16x128xf32>
    %cst_11 = arith.constant dense<0xFF800000> : vector<16xf32>
    %26 = vector.multi_reduction <maximumf>, %25, %cst_11 [1] : vector<16x128xf32> to vector<16xf32>
    %27 = vector.shape_cast %26 : vector<16xf32> to vector<16x1xf32>
    %28 = vector.shape_cast %23 : vector<16x1xf32> to vector<16x1xf32>
    %29 = vector.broadcast %28 : vector<16x1xf32> to vector<16x128xf32>
    %30 = vector.shape_cast %27 : vector<16x1xf32> to vector<16x1xf32>
    %31 = vector.broadcast %30 : vector<16x1xf32> to vector<16x128xf32>
    %32 = arith.select %14, %29, %31 : vector<16x128xi1>, vector<16x128xf32>
    %33 = arith.subf %11, %32 : vector<16x128xf32>
    %34 = math.exp %33 : vector<16x128xf32>
    %cst_12 = arith.constant 0.000000e+00 : f32
    %35 = vector.broadcast %cst_12 : f32 to vector<16x128xf32>
    %36 = arith.select %14, %34, %35 : vector<16x128xi1>, vector<16x128xf32>
    %cst_13 = arith.constant dense<0.000000e+00> : vector<16xf32>
    %37 = vector.multi_reduction <add>, %36, %cst_13 [1] : vector<16x128xf32> to vector<16xf32>
    %38 = vector.shape_cast %37 : vector<16xf32> to vector<16x1xf32>
    %cst_14 = arith.constant 0.000000e+00 : f32
    %39 = vector.broadcast %cst_14 : f32 to vector<16x128xf32>
    %40 = arith.select %19, %34, %39 : vector<16x128xi1>, vector<16x128xf32>
    %cst_15 = arith.constant dense<0.000000e+00> : vector<16xf32>
    %41 = vector.multi_reduction <add>, %40, %cst_15 [1] : vector<16x128xf32> to vector<16xf32>
    %42 = vector.shape_cast %41 : vector<16xf32> to vector<16x1xf32>
    %43 = arith.subf %11, %32 : vector<16x128xf32>
    %44 = vector.shape_cast %38 : vector<16x1xf32> to vector<16x1xf32>
    %45 = vector.broadcast %44 : vector<16x1xf32> to vector<16x128xf32>
    %46 = vector.shape_cast %42 : vector<16x1xf32> to vector<16x1xf32>
    %47 = vector.broadcast %46 : vector<16x1xf32> to vector<16x128xf32>
    %48 = arith.select %14, %45, %47 : vector<16x128xi1>, vector<16x128xf32>
    %49 = math.log %48 : vector<16x128xf32>
    %50 = arith.subf %43, %49 : vector<16x128xf32>
    %c0_16 = arith.constant 0 : index
    %c0_17 = arith.constant 0 : index
    %51 = vector.load %arg4[%c0_16, %c0_17] : memref<16x128xf32, #tpu.memory_space<vmem>>, vector<16x128xf32>
    tpu.vector_store %arg4[%c0_16, %c0_17], %50 {strides = array<i32>} : memref<16x128xf32, #tpu.memory_space<vmem>>, vector<16x128xf32>,
    return
  }
  func.func @transform_0(%arg0: i32) -> (i32, i32) {
    %c0_i32 = arith.constant 0 : i32
    %c0_i32_0 = arith.constant 0 : i32
    return %arg0, %c0_i32 : i32, i32
  }
  func.func @transform_1(%arg0: i32) -> (i32, i32) {
    %c0_i32 = arith.constant 0 : i32
    %c0_i32_0 = arith.constant 0 : i32
    %c0_i32_1 = arith.constant 0 : i32
    return %c0_i32, %c0_i32_0 : i32, i32
  }
  func.func @transform_2(%arg0: i32) -> (i32, i32) {
    %c0_i32 = arith.constant 0 : i32
    %c0_i32_0 = arith.constant 0 : i32
    %c0_i32_1 = arith.constant 0 : i32
    return %c0_i32, %c0_i32_0 : i32, i32
  }
  func.func @transform_3(%arg0: i32) -> (i32, i32) {
    %c0_i32 = arith.constant 0 : i32
    %c0_i32_0 = arith.constant 0 : i32
    return %arg0, %c0_i32 : i32, i32
  }
}

module attributes {stable_mosaic.version = 11 : i64} {
  func.func @_crf_kernel(%arg0: i32, %arg1: memref<1xi32, #tpu.memory_space<smem>>, %arg2: memref<8x8x16xf32, #tpu.memory_space<vmem>>, %arg3: memref<8x8x1xi32, #tpu.memory_space<vmem>>, %arg4: memref<8x8x1xi32, #tpu.memory_space<vmem>>, %arg5: memref<8x8x1xf32, #tpu.memory_space<vmem>>, %arg6: memref<8x1xi32, #tpu.memory_space<vmem>>, %arg7: memref<16x16xf32, #tpu.memory_space<vmem>>, %arg8: memref<1x1x16xf32, #tpu.memory_space<vmem>>, %arg9: memref<1x1x16xf32, #tpu.memory_space<vmem>>, %arg10: memref<1x1x128xf32, #tpu.memory_space<vmem>>, %arg11: memref<8x2xf32, #tpu.memory_space<vmem>>) attributes {dimension_semantics = [#tpu.dimension_semantics<parallel>], iteration_bounds = array<i64: 1>, scalar_prefetch = 1 : i64, scratch_operands = 0 : i64, tpu.core_type = #tpu.core_type<tc>, window_params = [{transform_indices = @transform_0, window_bounds = array<i64: 8, 8, 16>}, {transform_indices = @transform_1, window_bounds = array<i64: 8, 8, 1>}, {transform_indices = @transform_2, window_bounds = array<i64: 8, 8, 1>}, {transform_indices = @transform_3, window_bounds = array<i64: 8, 8, 1>}, {transform_indices = @transform_4, window_bounds = array<i64: 8, 1>}, {pipeline_mode = #tpu.pipeline_mode<synchronous>, transform_indices = @transform_5, window_bounds = array<i64: 16, 16>}, {pipeline_mode = #tpu.pipeline_mode<synchronous>, transform_indices = @transform_6, window_bounds = array<i64: 1, 1, 16>}, {pipeline_mode = #tpu.pipeline_mode<synchronous>, transform_indices = @transform_7, window_bounds = array<i64: 1, 1, 16>}, {pipeline_mode = #tpu.pipeline_mode<synchronous>, transform_indices = @transform_8, window_bounds = array<i64: 1, 1, 128>}, {transform_indices = @transform_9, window_bounds = array<i64: 8, 2>}]} {
    %c0 = arith.constant 0 : index
    %c0_0 = arith.constant 0 : index
    %c0_1 = arith.constant 0 : index
    %0 = vector.load %arg2[%c0, %c0_0, %c0_1] : memref<8x8x16xf32, #tpu.memory_space<vmem>>, vector<8x8x16xf32>
    %c0_2 = arith.constant 0 : index
    %c0_3 = arith.constant 0 : index
    %c0_4 = arith.constant 0 : index
    %1 = vector.load %arg3[%c0_2, %c0_3, %c0_4] : memref<8x8x1xi32, #tpu.memory_space<vmem>>, vector<8x8x1xi32>
    %c0_5 = arith.constant 0 : index
    %c0_6 = arith.constant 0 : index
    %c0_7 = arith.constant 0 : index
    %2 = vector.load %arg4[%c0_5, %c0_6, %c0_7] : memref<8x8x1xi32, #tpu.memory_space<vmem>>, vector<8x8x1xi32>
    %c0_8 = arith.constant 0 : index
    %c0_9 = arith.constant 0 : index
    %c0_10 = arith.constant 0 : index
    %3 = vector.load %arg5[%c0_8, %c0_9, %c0_10] : memref<8x8x1xf32, #tpu.memory_space<vmem>>, vector<8x8x1xf32>
    %c0_11 = arith.constant 0 : index
    %c0_12 = arith.constant 0 : index
    %4 = vector.load %arg6[%c0_11, %c0_12] : memref<8x1xi32, #tpu.memory_space<vmem>>, vector<8x1xi32>
    %c0_13 = arith.constant 0 : index
    %c0_14 = arith.constant 0 : index
    %5 = vector.load %arg7[%c0_13, %c0_14] : memref<16x16xf32, #tpu.memory_space<vmem>>, vector<16x16xf32>
    %c0_15 = arith.constant 0 : index
    %c0_16 = arith.constant 0 : index
    %c0_17 = arith.constant 0 : index
    %6 = vector.load %arg8[%c0_15, %c0_16, %c0_17] : memref<1x1x16xf32, #tpu.memory_space<vmem>>, vector<1x1x16xf32>
    %c0_18 = arith.constant 0 : index
    %c0_19 = arith.constant 0 : index
    %c0_20 = arith.constant 0 : index
    %7 = vector.load %arg9[%c0_18, %c0_19, %c0_20] : memref<1x1x16xf32, #tpu.memory_space<vmem>>, vector<1x1x16xf32>
    %c0_21 = arith.constant 0 : index
    %c0_22 = arith.constant 0 : index
    %c0_23 = arith.constant 0 : index
    %8 = vector.load %arg10[%c0_21, %c0_22, %c0_23] : memref<1x1x128xf32, #tpu.memory_space<vmem>>, vector<1x1x128xf32>
    %9 = tpu.iota {dimensions = array<i32: 2>} : vector<1x1x16xi32>
    %10 = vector.broadcast %9 : vector<1x1x16xi32> to vector<8x8x16xi32>
    %11 = vector.broadcast %1 : vector<8x8x1xi32> to vector<8x8x16xi32>
    %12 = arith.cmpi eq, %10, %11 : vector<8x8x16xi32>
    %c8_i32 = arith.constant 8 : i32
    %13 = vector.broadcast %c8_i32 : i32 to vector<8x8x1xi32>
    %14 = arith.addi %2, %13 : vector<8x8x1xi32>
    %15 = vector.broadcast %9 : vector<1x1x16xi32> to vector<8x8x16xi32>
    %16 = vector.broadcast %14 : vector<8x8x1xi32> to vector<8x8x16xi32>
    %17 = arith.cmpi eq, %15, %16 : vector<8x8x16xi32>
    %18 = arith.ori %12, %17 : vector<8x8x16xi1>
    %19 = arith.extui %18 : vector<8x8x16xi1> to vector<8x8x16xi32>
    %20 = arith.sitofp %19 : vector<8x8x16xi32> to vector<8x8x16xf32>
    %21 = arith.mulf %0, %20 : vector<8x8x16xf32>
    %22 = vector.broadcast %3 : vector<8x8x1xf32> to vector<8x8x16xf32>
    %23 = arith.mulf %21, %22 : vector<8x8x16xf32>
    %cst = arith.constant dense<0.000000e+00> : vector<8x16xf32>
    %24 = vector.multi_reduction <add>, %23, %cst [0] : vector<8x8x16xf32> to vector<8x16xf32>
    %25 = tpu.iota {dimensions = array<i32: 1>} : vector<8x16xi32>
    %c8_i32_24 = arith.constant 8 : i32
    %26 = vector.broadcast %c8_i32_24 : i32 to vector<8x16xi32>
    %27 = arith.cmpi slt, %25, %26 : vector<8x16xi32>
    %cst_25 = arith.constant 0.000000e+00 : f32
    %28 = vector.broadcast %cst_25 : f32 to vector<8x16xf32>
    %29 = arith.select %27, %24, %28 : vector<8x16xi1>, vector<8x16xf32>
    %cst_26 = arith.constant dense<0.000000e+00> : vector<8xf32>
    %30 = vector.multi_reduction <add>, %29, %cst_26 [1] : vector<8x16xf32> to vector<8xf32>
    %31 = vector.shape_cast %30 : vector<8xf32> to vector<8x1xf32>
    %cst_27 = arith.constant 0.000000e+00 : f32
    %32 = vector.broadcast %cst_27 : f32 to vector<8x16xf32>
    %33 = arith.select %27, %32, %24 : vector<8x16xi1>, vector<8x16xf32>
    %cst_28 = arith.constant dense<0.000000e+00> : vector<8xf32>
    %34 = vector.multi_reduction <add>, %33, %cst_28 [1] : vector<8x16xf32> to vector<8xf32>
    %35 = vector.shape_cast %34 : vector<8xf32> to vector<8x1xf32>
    %36 = vector.shape_cast %6 : vector<1x1x16xf32> to vector<1x16xf32>
    %37 = vector.extract_strided_slice %20 {offsets = [0, 0, 0], sizes = [1, 8, 16], strides = [1, 1, 1]} : vector<8x8x16xf32> to vector<1x8x16xf32>
    %38 = vector.shape_cast %37 : vector<1x8x16xf32> to vector<8x16xf32>
    %39 = vector.broadcast %36 : vector<1x16xf32> to vector<8x16xf32>
    %40 = arith.mulf %39, %38 : vector<8x16xf32>
    %41 = tpu.iota {dimensions = array<i32: 1>} : vector<8x16xi32>
    %c8_i32_29 = arith.constant 8 : i32
    %42 = vector.broadcast %c8_i32_29 : i32 to vector<8x16xi32>
    %43 = arith.cmpi slt, %41, %42 : vector<8x16xi32>
    %cst_30 = arith.constant 0.000000e+00 : f32
    %44 = vector.broadcast %cst_30 : f32 to vector<8x16xf32>
    %45 = arith.select %43, %40, %44 : vector<8x16xi1>, vector<8x16xf32>
    %cst_31 = arith.constant dense<0.000000e+00> : vector<8xf32>
    %46 = vector.multi_reduction <add>, %45, %cst_31 [1] : vector<8x16xf32> to vector<8xf32>
    %47 = vector.shape_cast %46 : vector<8xf32> to vector<8x1xf32>
    %cst_32 = arith.constant 0.000000e+00 : f32
    %48 = vector.broadcast %cst_32 : f32 to vector<8x16xf32>
    %49 = arith.select %43, %48, %40 : vector<8x16xi1>, vector<8x16xf32>
    %cst_33 = arith.constant dense<0.000000e+00> : vector<8xf32>
    %50 = vector.multi_reduction <add>, %49, %cst_33 [1] : vector<8x16xf32> to vector<8xf32>
    %51 = vector.shape_cast %50 : vector<8xf32> to vector<8x1xf32>
    %52 = vector.broadcast %7 : vector<1x1x16xf32> to vector<8x8x16xf32>
    %53 = arith.mulf %52, %20 : vector<8x8x16xf32>
    %54 = tpu.iota {dimensions = array<i32: 2>} : vector<8x8x16xi32>
    %c8_i32_34 = arith.constant 8 : i32
    %55 = vector.broadcast %c8_i32_34 : i32 to vector<8x8x16xi32>
    %56 = arith.cmpi slt, %54, %55 : vector<8x8x16xi32>
    %cst_35 = arith.constant 0.000000e+00 : f32
    %57 = vector.broadcast %cst_35 : f32 to vector<8x8x16xf32>
    %58 = arith.select %56, %53, %57 : vector<8x8x16xi1>, vector<8x8x16xf32>
    %cst_36 = arith.constant dense<0.000000e+00> : vector<8x8xf32>
    %59 = vector.multi_reduction <add>, %58, %cst_36 [2] : vector<8x8x16xf32> to vector<8x8xf32>
    %60 = vector.shape_cast %59 : vector<8x8xf32> to vector<8x8x1xf32>
    %cst_37 = arith.constant 0.000000e+00 : f32
    %61 = vector.broadcast %cst_37 : f32 to vector<8x8x16xf32>
    %62 = arith.select %56, %61, %53 : vector<8x8x16xi1>, vector<8x8x16xf32>
    %cst_38 = arith.constant dense<0.000000e+00> : vector<8x8xf32>
    %63 = vector.multi_reduction <add>, %62, %cst_38 [2] : vector<8x8x16xf32> to vector<8x8xf32>
    %64 = vector.shape_cast %63 : vector<8x8xf32> to vector<8x8x1xf32>
    %65 = vector.extract_strided_slice %3 {offsets = [0, 0, 0], sizes = [7, 8, 1], strides = [1, 1, 1]} : vector<8x8x1xf32> to vector<7x8x1xf32>
    %66 = vector.extract_strided_slice %3 {offsets = [1, 0, 0], sizes = [7, 8, 1], strides = [1, 1, 1]} : vector<8x8x1xf32> to vector<7x8x1xf32>
    %cst_39 = arith.constant 1.000000e+00 : f32
    %67 = vector.broadcast %cst_39 : f32 to vector<7x8x1xf32>
    %68 = arith.subf %67, %66 : vector<7x8x1xf32>
    %69 = arith.mulf %65, %68 : vector<7x8x1xf32>
    %70 = vector.extract_strided_slice %60 {offsets = [0, 0, 0], sizes = [7, 8, 1], strides = [1, 1, 1]} : vector<8x8x1xf32> to vector<7x8x1xf32>
    %71 = arith.mulf %69, %70 : vector<7x8x1xf32>
    %cst_40 = arith.constant dense<0.000000e+00> : vector<8x1xf32>
    %72 = vector.multi_reduction <add>, %71, %cst_40 [0] : vector<7x8x1xf32> to vector<8x1xf32>
    %73 = vector.extract_strided_slice %3 {offsets = [7, 0, 0], sizes = [1, 8, 1], strides = [1, 1, 1]} : vector<8x8x1xf32> to vector<1x8x1xf32>
    %74 = vector.shape_cast %73 : vector<1x8x1xf32> to vector<8x1xf32>
    %75 = vector.extract_strided_slice %60 {offsets = [7, 0, 0], sizes = [1, 8, 1], strides = [1, 1, 1]} : vector<8x8x1xf32> to vector<1x8x1xf32>
    %76 = vector.shape_cast %75 : vector<1x8x1xf32> to vector<8x1xf32>
    %77 = arith.mulf %74, %76 : vector<8x1xf32>
    %78 = arith.addf %72, %77 : vector<8x1xf32>
    %79 = vector.extract_strided_slice %64 {offsets = [0, 0, 0], sizes = [7, 8, 1], strides = [1, 1, 1]} : vector<8x8x1xf32> to vector<7x8x1xf32>
    %80 = arith.mulf %69, %79 : vector<7x8x1xf32>
    %cst_41 = arith.constant dense<0.000000e+00> : vector<8x1xf32>
    %81 = vector.multi_reduction <add>, %80, %cst_41 [0] : vector<7x8x1xf32> to vector<8x1xf32>
    %82 = vector.extract_strided_slice %3 {offsets = [7, 0, 0], sizes = [1, 8, 1], strides = [1, 1, 1]} : vector<8x8x1xf32> to vector<1x8x1xf32>
    %83 = vector.shape_cast %82 : vector<1x8x1xf32> to vector<8x1xf32>
    %84 = vector.extract_strided_slice %64 {offsets = [7, 0, 0], sizes = [1, 8, 1], strides = [1, 1, 1]} : vector<8x8x1xf32> to vector<1x8x1xf32>
    %85 = vector.shape_cast %84 : vector<1x8x1xf32> to vector<8x1xf32>
    %86 = arith.mulf %83, %85 : vector<8x1xf32>
    %87 = arith.addf %81, %86 : vector<8x1xf32>
    %88 = tpu.iota {dimensions = array<i32: 2>} : vector<1x1x128xi32>
    %89 = vector.extract_strided_slice %1 {offsets = [0, 0, 0], sizes = [7, 8, 1], strides = [1, 1, 1]} : vector<8x8x1xi32> to vector<7x8x1xi32>
    %c8_i32_42 = arith.constant 8 : i32
    %90 = vector.broadcast %c8_i32_42 : i32 to vector<7x8x1xi32>
    %91 = arith.muli %89, %90 : vector<7x8x1xi32>
    %92 = vector.extract_strided_slice %1 {offsets = [1, 0, 0], sizes = [7, 8, 1], strides = [1, 1, 1]} : vector<8x8x1xi32> to vector<7x8x1xi32>
    %93 = arith.addi %91, %92 : vector<7x8x1xi32>
    %94 = vector.extract_strided_slice %2 {offsets = [0, 0, 0], sizes = [7, 8, 1], strides = [1, 1, 1]} : vector<8x8x1xi32> to vector<7x8x1xi32>
    %c8_i32_43 = arith.constant 8 : i32
    %95 = vector.broadcast %c8_i32_43 : i32 to vector<7x8x1xi32>
    %96 = arith.muli %94, %95 : vector<7x8x1xi32>
    %97 = vector.extract_strided_slice %2 {offsets = [1, 0, 0], sizes = [7, 8, 1], strides = [1, 1, 1]} : vector<8x8x1xi32> to vector<7x8x1xi32>
    %98 = arith.addi %96, %97 : vector<7x8x1xi32>
    %c64_i32 = arith.constant 64 : i32
    %99 = vector.broadcast %c64_i32 : i32 to vector<7x8x1xi32>
    %100 = arith.addi %98, %99 : vector<7x8x1xi32>
    %101 = vector.broadcast %88 : vector<1x1x128xi32> to vector<7x8x128xi32>
    %102 = vector.broadcast %93 : vector<7x8x1xi32> to vector<7x8x128xi32>
    %103 = arith.cmpi eq, %101, %102 : vector<7x8x128xi32>
    %104 = vector.broadcast %88 : vector<1x1x128xi32> to vector<7x8x128xi32>
    %105 = vector.broadcast %100 : vector<7x8x1xi32> to vector<7x8x128xi32>
    %106 = arith.cmpi eq, %104, %105 : vector<7x8x128xi32>
    %107 = arith.ori %103, %106 : vector<7x8x128xi1>
    %108 = arith.extui %107 : vector<7x8x128xi1> to vector<7x8x128xi32>
    %109 = arith.sitofp %108 : vector<7x8x128xi32> to vector<7x8x128xf32>
    %110 = vector.broadcast %8 : vector<1x1x128xf32> to vector<7x8x128xf32>
    %111 = arith.mulf %110, %109 : vector<7x8x128xf32>
    %112 = vector.extract_strided_slice %3 {offsets = [1, 0, 0], sizes = [7, 8, 1], strides = [1, 1, 1]} : vector<8x8x1xf32> to vector<7x8x1xf32>
    %113 = vector.broadcast %112 : vector<7x8x1xf32> to vector<7x8x128xf32>
    %114 = arith.mulf %111, %113 : vector<7x8x128xf32>
    %cst_44 = arith.constant dense<0.000000e+00> : vector<8x128xf32>
    %115 = vector.multi_reduction <add>, %114, %cst_44 [0] : vector<7x8x128xf32> to vector<8x128xf32>
    %116 = tpu.iota {dimensions = array<i32: 1>} : vector<8x128xi32>
    %c64_i32_45 = arith.constant 64 : i32
    %117 = vector.broadcast %c64_i32_45 : i32 to vector<8x128xi32>
    %118 = arith.cmpi slt, %116, %117 : vector<8x128xi32>
    %cst_46 = arith.constant 0.000000e+00 : f32
    %119 = vector.broadcast %cst_46 : f32 to vector<8x128xf32>
    %120 = arith.select %118, %115, %119 : vector<8x128xi1>, vector<8x128xf32>
    %cst_47 = arith.constant dense<0.000000e+00> : vector<8xf32>
    %121 = vector.multi_reduction <add>, %120, %cst_47 [1] : vector<8x128xf32> to vector<8xf32>
    %122 = vector.shape_cast %121 : vector<8xf32> to vector<8x1xf32>
    %cst_48 = arith.constant 0.000000e+00 : f32
    %123 = vector.broadcast %cst_48 : f32 to vector<8x128xf32>
    %124 = arith.select %118, %123, %115 : vector<8x128xi1>, vector<8x128xf32>
    %cst_49 = arith.constant dense<0.000000e+00> : vector<8xf32>
    %125 = vector.multi_reduction <add>, %124, %cst_49 [1] : vector<8x128xf32> to vector<8xf32>
    %126 = vector.shape_cast %125 : vector<8xf32> to vector<8x1xf32>
    %127 = arith.addf %47, %31 : vector<8x1xf32>
    %128 = arith.addf %127, %122 : vector<8x1xf32>
    %129 = arith.addf %128, %78 : vector<8x1xf32>
    %130 = arith.addf %51, %35 : vector<8x1xf32>
    %131 = arith.addf %130, %126 : vector<8x1xf32>
    %132 = arith.addf %131, %87 : vector<8x1xf32>
    %133 = tpu.iota {dimensions = array<i32: 1>} : vector<1x16xi32>
    %c8_i32_50 = arith.constant 8 : i32
    %134 = vector.broadcast %c8_i32_50 : i32 to vector<1x16xi32>
    %135 = arith.cmpi slt, %133, %134 : vector<1x16xi32>
    %136 = vector.shape_cast %6 : vector<1x1x16xf32> to vector<1x16xf32>
    %137 = vector.extract_strided_slice %0 {offsets = [0, 0, 0], sizes = [1, 8, 16], strides = [1, 1, 1]} : vector<8x8x16xf32> to vector<1x8x16xf32>
    %138 = vector.shape_cast %137 : vector<1x8x16xf32> to vector<8x16xf32>
    %139 = vector.broadcast %136 : vector<1x16xf32> to vector<8x16xf32>
    %140 = arith.addf %139, %138 : vector<8x16xf32>
    %141 = arith.index_cast %arg0 : i32 to index
    %142 = memref.load %arg1[%141] : memref<1xi32, #tpu.memory_space<smem>>
    %c1_i32 = arith.constant 1 : i32
    %143 = arith.subi %142, %c1_i32 : i32
    %144 = arith.addi %c1_i32, %143 : i32
    %c1_i32_51 = arith.constant 1 : i32
    %145 = scf.for %arg12 = %c1_i32 to %144 step %c1_i32_51 iter_args(%arg13 = %140) -> (vector<8x16xf32>)  : i32 {
      %187 = arith.index_cast %arg12 : i32 to index
      %c0_63 = arith.constant 0 : index
      %c0_64 = arith.constant 0 : index
      %188 = vector.load %arg2[%187, %c0_63, %c0_64] : memref<8x8x16xf32, #tpu.memory_space<vmem>>, vector<1x8x16xf32>
      %189 = vector.shape_cast %188 : vector<1x8x16xf32> to vector<8x16xf32>
      %cst_65 = arith.constant -1.000000e+09 : f32
      %190 = vector.shape_cast %135 : vector<1x16xi1> to vector<1x16xi1>
      %191 = vector.broadcast %190 : vector<1x16xi1> to vector<8x16xi1>
      %192 = vector.broadcast %cst_65 : f32 to vector<8x16xf32>
      %193 = arith.select %191, %arg13, %192 : vector<8x16xi1>, vector<8x16xf32>
      %cst_66 = arith.constant dense<0xFF800000> : vector<8xf32>
      %194 = vector.multi_reduction <maximumf>, %193, %cst_66 [1] : vector<8x16xf32> to vector<8xf32>
      %195 = vector.shape_cast %194 : vector<8xf32> to vector<8x1xf32>
      %cst_67 = arith.constant -1.000000e+09 : f32
      %196 = vector.shape_cast %135 : vector<1x16xi1> to vector<1x16xi1>
      %197 = vector.broadcast %196 : vector<1x16xi1> to vector<8x16xi1>
      %198 = vector.broadcast %cst_67 : f32 to vector<8x16xf32>
      %199 = arith.select %197, %198, %arg13 : vector<8x16xi1>, vector<8x16xf32>
      %cst_68 = arith.constant dense<0xFF800000> : vector<8xf32>
      %200 = vector.multi_reduction <maximumf>, %199, %cst_68 [1] : vector<8x16xf32> to vector<8xf32>
      %201 = vector.shape_cast %200 : vector<8xf32> to vector<8x1xf32>
      %202 = vector.shape_cast %135 : vector<1x16xi1> to vector<1x16xi1>
      %203 = vector.broadcast %202 : vector<1x16xi1> to vector<8x16xi1>
      %204 = vector.shape_cast %195 : vector<8x1xf32> to vector<8x1xf32>
      %205 = vector.broadcast %204 : vector<8x1xf32> to vector<8x16xf32>
      %206 = vector.shape_cast %201 : vector<8x1xf32> to vector<8x1xf32>
      %207 = vector.broadcast %206 : vector<8x1xf32> to vector<8x16xf32>
      %208 = arith.select %203, %205, %207 : vector<8x16xi1>, vector<8x16xf32>
      %209 = arith.subf %arg13, %208 : vector<8x16xf32>
      %210 = math.exp %209 : vector<8x16xf32>
      %cst_69 = arith.constant dense<0.000000e+00> : vector<8x16xf32>
      %211 = tpu.matmul %210, %5, %cst_69 {dimension_numbers = #tpu.dot_dimension_numbers<[1], [0], [0], [1], [0, 0, 1, 1], [], []>} : vector<8x16xf32>, vector<16x16xf32>, vector<8x16xf32> -> vector<8x16xf32>
      %cst_70 = arith.constant 1.000000e-30 : f32
      %212 = vector.broadcast %cst_70 : f32 to vector<8x16xf32>
      %213 = arith.maximumf %211, %212 : vector<8x16xf32>
      %214 = math.log %213 : vector<8x16xf32>
      %215 = arith.addf %208, %214 : vector<8x16xf32>
      %216 = arith.addf %215, %189 : vector<8x16xf32>
      %217 = vector.broadcast %arg12 : i32 to vector<8x1xi32>
      %218 = arith.cmpi slt, %217, %4 : vector<8x1xi32>
      %219 = vector.shape_cast %218 : vector<8x1xi1> to vector<8x1xi1>
      %220 = vector.broadcast %219 : vector<8x1xi1> to vector<8x16xi1>
      %221 = arith.select %220, %216, %arg13 : vector<8x16xi1>, vector<8x16xf32>
      scf.yield %221 : vector<8x16xf32>
    }
    %146 = vector.shape_cast %7 : vector<1x1x16xf32> to vector<1x16xf32>
    %147 = vector.broadcast %146 : vector<1x16xf32> to vector<8x16xf32>
    %148 = arith.addf %145, %147 : vector<8x16xf32>
    %cst_52 = arith.constant -1.000000e+09 : f32
    %149 = vector.shape_cast %135 : vector<1x16xi1> to vector<1x16xi1>
    %150 = vector.broadcast %149 : vector<1x16xi1> to vector<8x16xi1>
    %151 = vector.broadcast %cst_52 : f32 to vector<8x16xf32>
    %152 = arith.select %150, %148, %151 : vector<8x16xi1>, vector<8x16xf32>
    %cst_53 = arith.constant dense<0xFF800000> : vector<8xf32>
    %153 = vector.multi_reduction <maximumf>, %152, %cst_53 [1] : vector<8x16xf32> to vector<8xf32>
    %154 = vector.shape_cast %153 : vector<8xf32> to vector<8x1xf32>
    %cst_54 = arith.constant -1.000000e+09 : f32
    %155 = vector.shape_cast %135 : vector<1x16xi1> to vector<1x16xi1>
    %156 = vector.broadcast %155 : vector<1x16xi1> to vector<8x16xi1>
    %157 = vector.broadcast %cst_54 : f32 to vector<8x16xf32>
    %158 = arith.select %156, %157, %148 : vector<8x16xi1>, vector<8x16xf32>
    %cst_55 = arith.constant dense<0xFF800000> : vector<8xf32>
    %159 = vector.multi_reduction <maximumf>, %158, %cst_55 [1] : vector<8x16xf32> to vector<8xf32>
    %160 = vector.shape_cast %159 : vector<8xf32> to vector<8x1xf32>
    %cst_56 = arith.constant -1.000000e+09 : f32
    %161 = vector.shape_cast %135 : vector<1x16xi1> to vector<1x16xi1>
    %162 = vector.broadcast %161 : vector<1x16xi1> to vector<8x16xi1>
    %163 = vector.broadcast %cst_56 : f32 to vector<8x16xf32>
    %164 = arith.select %162, %148, %163 : vector<8x16xi1>, vector<8x16xf32>
    %165 = vector.broadcast %154 : vector<8x1xf32> to vector<8x16xf32>
    %166 = arith.subf %164, %165 : vector<8x16xf32>
    %167 = math.exp %166 : vector<8x16xf32>
    %cst_57 = arith.constant -1.000000e+09 : f32
    %168 = vector.shape_cast %135 : vector<1x16xi1> to vector<1x16xi1>
    %169 = vector.broadcast %168 : vector<1x16xi1> to vector<8x16xi1>
    %170 = vector.broadcast %cst_57 : f32 to vector<8x16xf32>
    %171 = arith.select %169, %170, %148 : vector<8x16xi1>, vector<8x16xf32>
    %172 = vector.broadcast %160 : vector<8x1xf32> to vector<8x16xf32>
    %173 = arith.subf %171, %172 : vector<8x16xf32>
    %174 = math.exp %173 : vector<8x16xf32>
    %cst_58 = arith.constant dense<0.000000e+00> : vector<8xf32>
    %175 = vector.multi_reduction <add>, %167, %cst_58 [1] : vector<8x16xf32> to vector<8xf32>
    %176 = vector.shape_cast %175 : vector<8xf32> to vector<8x1xf32>
    %177 = math.log %176 : vector<8x1xf32>
    %178 = arith.addf %154, %177 : vector<8x1xf32>
    %cst_59 = arith.constant dense<0.000000e+00> : vector<8xf32>
    %179 = vector.multi_reduction <add>, %174, %cst_59 [1] : vector<8x16xf32> to vector<8xf32>
    %180 = vector.shape_cast %179 : vector<8xf32> to vector<8x1xf32>
    %181 = math.log %180 : vector<8x1xf32>
    %182 = arith.addf %160, %181 : vector<8x1xf32>
    %183 = arith.subf %129, %178 : vector<8x1xf32>
    %c0_60 = arith.constant 0 : index
    %c0_61 = arith.constant 0 : index
    %184 = vector.load %arg11[%c0_60, %c0_61] : memref<8x2xf32, #tpu.memory_space<vmem>>, vector<8x1xf32>
    tpu.vector_store %arg11[%c0_60, %c0_61], %183 {strides = array<i32>} : memref<8x2xf32, #tpu.memory_space<vmem>>, vector<8x1xf32>,
    %185 = arith.subf %132, %182 : vector<8x1xf32>
    %c0_62 = arith.constant 0 : index
    %c1 = arith.constant 1 : index
    %186 = vector.load %arg11[%c0_62, %c1] : memref<8x2xf32, #tpu.memory_space<vmem>>, vector<8x1xf32>
    tpu.vector_store %arg11[%c0_62, %c1], %185 {strides = array<i32>} : memref<8x2xf32, #tpu.memory_space<vmem>>, vector<8x1xf32>,
    return
  }
  func.func @transform_0(%arg0: i32, %arg1: memref<1xi32, #tpu.memory_space<smem>>) -> (i32, i32, i32) {
    %c0_i32 = arith.constant 0 : i32
    %c0_i32_0 = arith.constant 0 : i32
    %c0_i32_1 = arith.constant 0 : i32
    return %c0_i32, %arg0, %c0_i32_0 : i32, i32, i32
  }
  func.func @transform_1(%arg0: i32, %arg1: memref<1xi32, #tpu.memory_space<smem>>) -> (i32, i32, i32) {
    %c0_i32 = arith.constant 0 : i32
    %c0_i32_0 = arith.constant 0 : i32
    %c0_i32_1 = arith.constant 0 : i32
    return %c0_i32, %arg0, %c0_i32_0 : i32, i32, i32
  }
  func.func @transform_2(%arg0: i32, %arg1: memref<1xi32, #tpu.memory_space<smem>>) -> (i32, i32, i32) {
    %c0_i32 = arith.constant 0 : i32
    %c0_i32_0 = arith.constant 0 : i32
    %c0_i32_1 = arith.constant 0 : i32
    return %c0_i32, %arg0, %c0_i32_0 : i32, i32, i32
  }
  func.func @transform_3(%arg0: i32, %arg1: memref<1xi32, #tpu.memory_space<smem>>) -> (i32, i32, i32) {
    %c0_i32 = arith.constant 0 : i32
    %c0_i32_0 = arith.constant 0 : i32
    %c0_i32_1 = arith.constant 0 : i32
    return %c0_i32, %arg0, %c0_i32_0 : i32, i32, i32
  }
  func.func @transform_4(%arg0: i32, %arg1: memref<1xi32, #tpu.memory_space<smem>>) -> (i32, i32) {
    %c0_i32 = arith.constant 0 : i32
    %c0_i32_0 = arith.constant 0 : i32
    return %arg0, %c0_i32 : i32, i32
  }
  func.func @transform_5(%arg0: i32, %arg1: memref<1xi32, #tpu.memory_space<smem>>) -> (i32, i32) {
    %c0_i32 = arith.constant 0 : i32
    %c0_i32_0 = arith.constant 0 : i32
    %c0_i32_1 = arith.constant 0 : i32
    return %c0_i32, %c0_i32_0 : i32, i32
  }
  func.func @transform_6(%arg0: i32, %arg1: memref<1xi32, #tpu.memory_space<smem>>) -> (i32, i32, i32) {
    %c0_i32 = arith.constant 0 : i32
    %c0_i32_0 = arith.constant 0 : i32
    %c0_i32_1 = arith.constant 0 : i32
    %c0_i32_2 = arith.constant 0 : i32
    return %c0_i32, %c0_i32_0, %c0_i32_1 : i32, i32, i32
  }
  func.func @transform_7(%arg0: i32, %arg1: memref<1xi32, #tpu.memory_space<smem>>) -> (i32, i32, i32) {
    %c0_i32 = arith.constant 0 : i32
    %c0_i32_0 = arith.constant 0 : i32
    %c0_i32_1 = arith.constant 0 : i32
    %c0_i32_2 = arith.constant 0 : i32
    return %c0_i32, %c0_i32_0, %c0_i32_1 : i32, i32, i32
  }
  func.func @transform_8(%arg0: i32, %arg1: memref<1xi32, #tpu.memory_space<smem>>) -> (i32, i32, i32) {
    %c0_i32 = arith.constant 0 : i32
    %c0_i32_0 = arith.constant 0 : i32
    %c0_i32_1 = arith.constant 0 : i32
    %c0_i32_2 = arith.constant 0 : i32
    return %c0_i32, %c0_i32_0, %c0_i32_1 : i32, i32, i32
  }
  func.func @transform_9(%arg0: i32, %arg1: memref<1xi32, #tpu.memory_space<smem>>) -> (i32, i32) {
    %c0_i32 = arith.constant 0 : i32
    %c0_i32_0 = arith.constant 0 : i32
    return %arg0, %c0_i32 : i32, i32
  }
}

</mosaic_0001>

<bundles_post_ra>
// kernel: cascade_forward.2
= control target key start
LH: loop header
LB: loop body
LE: loop exit
PB: predicated region body
PF: predicated region fallthrough
CT: control target
= control target key end

     0   :  { %v244_v0 = vmov 0.0   ;;  %vm245_vm0 = vmmov 0   ;;  %v136_v16 = vlaneseq  ;;  %s325_s1 = inlined_call_operand.vmem [shape: bf16[128,128], index: 1, kind: input, shape index: {}]   ;;  %s326_s0 = inlined_call_operand.vmem [shape: f32[16,128], index: 0, kind: input, shape index: {}]   ;;  %s327_s2 = inlined_call_operand.vmem [shape: f32[1,128], index: 2, kind: input, shape index: {}]   ;;  %s328_s3 = inlined_call_operand.vmem [shape: f32[16,128], index: 3, kind: output, shape index: {}]  }
   0x1   :  { %206 = vmatprep.subr.bf16.mxu0 %v244_v0  ;;  %v228_v1 = vld [vmem:[%s325_s1 + $0x38] sm:$0xff]   ;;  %222 = vmatprep.mubr.msk.bf16.mxu0 %vm245_vm0, %v244_v0  ;;  %v229_v2 = vld [vmem:[%s325_s1 + $0x30] sm:$0xff]   ;;  %v230_v3 = vld [vmem:[%s325_s1 + $0x28] sm:$0xff]  }
   0x2   :  { %207 = vmatpush3.bf16.msra.mxu0 %v228_v1  ;;  %v231_v4 = vld [vmem:[%s325_s1 + $0x20] sm:$0xff]   ;;  %v232_v5 = vld [vmem:[%s325_s1 + $0x18] sm:$0xff]   ;;  %v233_v6 = vld [vmem:[%s325_s1 + $0x10] sm:$0xff]   ;;  %v137_v17 = vand.u32 127, %v136_v16 }
   0x3   :  { %208 = vmatprep.subr.bf16.mxu0 %v244_v0  ;;  %v15_v7 = vld [vmem:[%s326_s0] sm:$0xff]  ;;  %v16_v8 = vld [vmem:[%s326_s0 + $0x8] sm:$0xff] }
   0x4   :  { %v234_v9 = vld [vmem:[%s325_s1 + $0x8] sm:$0xff]   ;;  %v19_v10 = vmul.f32 0.01, %v15_v7  ;;  %v20_v11 = vmul.f32 0.01, %v16_v8  ;;  %vm17_vm1 = vcmp.ge.f32.partialorder %v15_v7, 0.0 }
   0x5   :  { %vm18_vm2 = vcmp.ge.f32.partialorder %v16_v8, 0.0  ;;  %v235_v12 = vld [vmem:[%s325_s1] sm:$0xff]   ;;  %vm139_vm3 = vcmp.ge.s32.totalorder %v137_v17, 8  ;;  %vm140_vm4 = vcmp.lt.s32.totalorder %v137_v17, 16  ;;  %vm138_vm5 = vcmp.lt.s32.totalorder %v137_v17, 8 }
   0x6   :  { %209 = vmatpush3.bf16.msra.mxu0 %v229_v2  ;;  %v21_v13 = vsel %vm17_vm1, %v15_v7, %v19_v10  ;;  %v22_v14 = vsel %vm18_vm2, %v16_v8, %v20_v11  ;;  %v188_v18 = vld [vmem:[%s327_s2] ss:$0 sm:$0xff]  ;;  %vm299_vm6 = vmand %vm139_vm3, %vm140_vm4 }
   0x7   :  { %210 = vmatprep.subr.bf16.mxu0 %v244_v0  ;;  %v23_v15 = vpack.c.bf16 %v22_v14, %v21_v13 }
   0xa   :  { %211 = vmatpush3.bf16.msra.mxu0 %v230_v3 }
   0xb   :  { %212 = vmatprep.subr.bf16.mxu0 %v244_v0 }
   0xe   :  { %213 = vmatpush3.bf16.msra.mxu0 %v231_v4 }
   0xf   :  { %214 = vmatprep.subr.bf16.mxu0 %v244_v0 }
  0x12   :  { %215 = vmatpush3.bf16.msra.mxu0 %v232_v5 }
  0x13   :  { %216 = vmatprep.subr.bf16.mxu0 %v244_v0 }
  0x16   :  { %217 = vmatpush3.bf16.msra.mxu0 %v233_v6 }
  0x17   :  { %218 = vmatprep.subr.bf16.mxu0 %v244_v0 }
  0x1a   :  { %219 = vmatpush3.bf16.msra.mxu0 %v234_v9 }
  0x1b   :  { %220 = vmatprep.subr.bf16.mxu0 %v244_v0 }
  0x1e   :  { %221 = vmatpush3.bf16.msra.mxu0 %v235_v12 }
  0x21   :  { %223 = vmatmul.mubr.bf16.vlgmr.msra.gmra.mxu0 %v23_v15 }
  0xe1   :  { %v129_v19 = vpop.f32.mrf.mxu0 }
  0xe2   :  { %v130_v21 = vadd.f32 %v188_v18, %v129_v19 }
  0xe3   :  { %v224_v22 = vpop.f32.mrf.mxu0 }
  0xe4   :  { %v148_v23 = vsel %vm299_vm6, %v130_v21, -1e+09  ;;  %v142_v24 = vsel %vm138_vm5, %v130_v21, -1e+09 }
  0xe5   :  { %150 = vmax.xlane.f32.xlu1 %v148_v23  ;;  %144 = vmax.xlane.f32.xlu0 %v142_v24  ;;  %v132_v25 = vpop.f32.mrf.mxu0 }
  0xe6   :  { %v133_v26 = vadd.f32 %v188_v18, %v132_v25 }
  0xe7   :  { %v225_v27 = vpop.f32.mrf.mxu0 }
  0xe8   :  { %v149_v28 = vsel %vm299_vm6, %v133_v26, -1e+09  ;;  %v143_v29 = vsel %vm138_vm5, %v133_v26, -1e+09 }
  0xe9   :  { %152 = vmax.xlane.f32.xlu1 %v149_v28  ;;  %146 = vmax.xlane.f32.xlu0 %v143_v29 }
 0x16e   :  { %v151_v30 = vpop.xlane.xlu1 %150  ;;  %v145_v31 = vpop.xlane.xlu0 %144 }
 0x16f   :  { %v154_v32 = vsel %vm138_vm5, %v145_v31, %v151_v30 }
 0x170   :  { %v156_v33 = vsub.f32 %v130_v21, %v154_v32 }
 0x172   :  { %v158_v34 = vmul.f32 1.442695, %v156_v33  ;;  %v153_v35 = vpop.xlane.xlu1 %152  ;;  %v147_v36 = vpop.xlane.xlu0 %146 }
 0x173   :  { %v155_v37 = vsel %vm138_vm5, %v147_v36, %v153_v35 }
 0x174   :  { %236 = vpow2.f32 %v158_v34  ;;  %v157_v38 = vsub.f32 %v133_v26, %v155_v37 }
 0x176   :  { %v160_v39 = vmul.f32 1.442695, %v157_v38 }
 0x178   :  { %238 = vpow2.f32 %v160_v39 }
 0x181   :  { %v237_v40 = vpop.eup %236 }
 0x182   :  { %v162_v41 = vsel %vm138_vm5, %v237_v40, 0.0  ;;  %v168_v43 = vsel %vm299_vm6, %v237_v40, 0.0 }
 0x183   :  { %164 = vadd.xlane.f32.xlu0 %v162_v41 }
 0x185   :  { %v239_v42 = vpop.eup %238 }
 0x186   :  { %v163_v44 = vsel %vm138_vm5, %v239_v42, 0.0  ;;  %v169_v45 = vsel %vm299_vm6, %v239_v42, 0.0 }
 0x187   :  { %170 = vadd.xlane.f32.xlu0 %v168_v43  ;;  %166 = vadd.xlane.f32.xlu1 %v163_v44 }
 0x18b   :  { %172 = vadd.xlane.f32.xlu1 %v169_v45 }
 0x20c   :  { %v165_v46 = vpop.xlane.xlu0 %164 }
 0x210   :  { %v167_v47 = vpop.xlane.xlu1 %166  ;;  %v171_v48 = vpop.xlane.xlu0 %170 }
 0x211   :  { %v174_v49 = vsel %vm138_vm5, %v165_v46, %v171_v48 }
 0x212   :  { %240 = vlog2.f32 %v174_v49 }
 0x214   :  { %v173_v50 = vpop.xlane.xlu1 %172 }
 0x215   :  { %v175_v51 = vsel %vm138_vm5, %v167_v47, %v173_v50 }
 0x216   :  { %242 = vlog2.f32 %v175_v51 }
 0x21f   :  { %v241_v52 = vpop.eup %240 }
 0x220   :  { %v177_v53 = vmul.f32 0.6931472, %v241_v52 }
 0x222   :  { %v180_v54 = vsub.f32 %v156_v33, %v177_v53 }
 0x223   :  { %v243_v55 = vpop.eup %242 }
 0x224   :  { %182 = vst [vmem:[%s328_s3] sm:$0xff] %v180_v54  ;;  %v179_v56 = vmul.f32 0.6931472, %v243_v55 }
 0x226   :  { %v181_v57 = vsub.f32 %v157_v38, %v179_v56 }
 0x228   :  { %183 = vst [vmem:[%s328_s3 + $0x8] sm:$0xff] %v181_v57 }

// kernel: cascade_forward.3
= control target key start
LH: loop header
LB: loop body
LE: loop exit
PB: predicated region body
PF: predicated region fallthrough
CT: control target
= control target key end

     0   :  { %v819_v0 = vmov 0   ;;  %vm226_vm7 = vcmask 130048   ;;  %s1366_s2 = inlined_call_operand.vmem [shape: s32[8,8,1], index: 2, kind: input, shape index: {}]   ;;  %s1367_s3 = inlined_call_operand.vmem [shape: s32[8,8,1], index: 3, kind: input, shape index: {}]   ;;  %s1368_s4 = inlined_call_operand.vmem [shape: f32[8,8,1], index: 4, kind: input, shape index: {}]   ;;  %s1369_s1 = inlined_call_operand.vmem [shape: f32[8,8,16], index: 1, kind: input, shape index: {}]   ;;  %s1370_s7 = inlined_call_operand.vmem [shape: f32[1,1,16], index: 7, kind: input, shape index: {}]   ;;  %s1371_s8 = inlined_call_operand.vmem [shape: f32[1,1,16], index: 8, kind: input, shape index: {}]   ;;  %s1372_s9 = inlined_call_operand.vmem [shape: f32[1,1,128], index: 9, kind: input, shape index: {}]   ;;  %s1373_s0 = inlined_call_operand.<no memory space> [shape: s32[1], index: 0, kind: input, shape index: {}]   ;;  %s1374_s5 = inlined_call_operand.vmem [shape: s32[8,1], index: 5, kind: input, shape index: {}]   ;;  %s1375_s6 = inlined_call_operand.vmem [shape: f32[16,16], index: 6, kind: input, shape index: {}]   ;;  %s1376_s10 = inlined_call_operand.vmem [shape: f32[8,2], index: 10, kind: output, shape index: {}]  }
   0x1   :  { %780 = vset.pattern.permute.xlu1 %v819_v0  ;;  %779 = vset.pattern.permute.xlu0 %v819_v0  ;;  %v883_v1 = vld [vmem:[%s1366_s2 + $0x10] sm:$0xff]  ;;  %v42_v2 = vld [vmem:[%s1366_s2] sm:$0xff]  ;;  %v892_v3 = vld [vmem:[%s1366_s2 + $0x18] sm:$0xff]  ;;  %p736_p0 = scmp.le.s32.totalorder %s1373_s0, 1 }
   0x2   :  { %81 = vperm.xlu1 %780, %v883_v1   ;;  %75 = vperm.xlu0 %779, %v42_v2   ;;  %v43_v4 = vld [vmem:[%s1366_s2 + $0x8] sm:$0xff]  ;;  %v906_v6 = vld [vmem:[%s1366_s2 + $0x20] sm:$0xff]  ;;  %v913_v7 = vld [vmem:[%s1366_s2 + $0x38] sm:$0xff]  ;;  %v403_v32 = vmul.u32 8, %v42_v2  ;;  %v405_v43 = vmul.u32 8, %v883_v1  ;;  %s1320_s19 = smov (!%p736_p0), 1  }
   0x3   :  { %v901_v5 = vld [vmem:[%s1366_s2 + $0x28] sm:$0xff]  ;;  %v918_v8 = vld [vmem:[%s1366_s2 + $0x30] sm:$0xff]  ;;  %v50_v10 = vld [vmem:[%s1367_s3] sm:$0xff]  ;;  %v404_v33 = vmul.u32 8, %v43_v4  ;;  %v406_v48 = vmul.u32 8, %v892_v3 }
   0x4   :  { %v51_v9 = vld [vmem:[%s1367_s3 + $0x8] sm:$0xff]  ;;  %v106_v12 = vadd.s32 8, %v50_v10  ;;  %v53_v13 = vld [vmem:[%s1367_s3 + $0x18] sm:$0xff]  ;;  %v52_v14 = vld [vmem:[%s1367_s3 + $0x10] sm:$0xff]  ;;  %v417_v34 = vmul.u32 8, %v50_v10  ;;  %v410_v38 = vadd.s32 %v403_v32, %v43_v4  ;;  %v412_v50 = vadd.s32 %v405_v43, %v892_v3 }
   0x5   :  { %v107_v11 = vadd.s32 8, %v51_v9  ;;  %v109_v15 = vadd.s32 8, %v53_v13  ;;  %v108_v16 = vadd.s32 8, %v52_v14  ;;  %v937_v17 = vld [vmem:[%s1367_s3 + $0x28] sm:$0xff]  ;;  %v54_v18 = vld [vmem:[%s1367_s3 + $0x20] sm:$0xff]  ;;  %v946_v21 = vld [vmem:[%s1367_s3 + $0x38] sm:$0xff]  ;;  %v411_v39 = vadd.s32 %v404_v33, %v883_v1 }
   0x6   :  { %84 = vperm.xlu1 %780, %v892_v3   ;;  %78 = vperm.xlu0 %779, %v43_v4   ;;  %v111_v19 = vadd.s32 8, %v937_v17  ;;  %v110_v20 = vadd.s32 8, %v54_v18  ;;  %v951_v22 = vld [vmem:[%s1367_s3 + $0x30] sm:$0xff]  ;;  %v113_v23 = vadd.s32 8, %v946_v21  ;;  %v958_v25 = vld [vmem:[%s1368_s4 + $0x8] sm:$0xff]  ;;  %v963_v26 = vld [vmem:[%s1368_s4] sm:$0xff]  ;;  %v424_v41 = vadd.s32 %v417_v34, %v51_v9 }
   0x7   :  { %v112_v24 = vadd.s32 8, %v951_v22  ;;  %v968_v27 = vld [vmem:[%s1370_s7] ss:$0 sm:$0xff]  ;;  %v984_v30 = vld [vmem:[%s1368_s4 + $0x18] sm:$0xff]  ;;  %v989_v31 = vld [vmem:[%s1368_s4 + $0x10] sm:$0xff]  ;;  %v418_v35 = vmul.u32 8, %v51_v9  ;;  %v413_v55 = vadd.s32 %v406_v48, %v906_v6 }
   0x8   :  { %v973_v28 = vld [vmem:[%s1369_s1] sm:$0xff]  ;;  %v996_v36 = vld [vmem:[%s1368_s4 + $0x28] sm:$0xff]  ;;  %v419_v42 = vmul.u32 8, %v52_v14  ;;  %v431_v45 = vadd.s32 64, %v424_v41  ;;  %v420_v47 = vmul.u32 8, %v53_v13  ;;  %v1024_v4 = vld [vmem:[%s1368_s4 + $0x30] sm:$0xff] }
   0x9   :  { %v977_v29 = vadd.f32 %v968_v27, %v973_v28   ;;  %v1001_v37 = vld [vmem:[%s1368_s4 + $0x20] sm:$0xff]  ;;  %v425_v40 = vadd.s32 %v418_v35, %v52_v14  ;;  %v421_v52 = vmul.u32 8, %v54_v18  ;;  %v407_v53 = vmul.u32 8, %v906_v6 }
   0xa   :  { %90 = vperm.xlu1 %780, %v901_v5   ;;  %87 = vperm.xlu0 %779, %v906_v6   ;;  %v426_v46 = vadd.s32 %v419_v42, %v53_v13  ;;  %v427_v51 = vadd.s32 %v420_v47, %v54_v18  ;;  %v422_v57 = vmul.u32 8, %v937_v17  ;;  %v408_v58 = vmul.u32 8, %v901_v5  ;;  %v1030_v6 = vld [vmem:[%s1368_s4 + $0x38] sm:$0xff] }
   0xb   :  { %v432_v44 = vadd.s32 64, %v425_v40  ;;  %v428_v56 = vadd.s32 %v421_v52, %v937_v17  ;;  %v414_v60 = vadd.s32 %v407_v53, %v901_v5  ;;  %v409_v62 = vmul.u32 8, %v918_v8 }
   0xc   :  { %v433_v49 = vadd.s32 64, %v426_v46  ;;  %v434_v54 = vadd.s32 64, %v427_v51  ;;  %v429_v61 = vadd.s32 %v422_v57, %v951_v22  ;;  %v415_v0 = vadd.s32 %v408_v58, %v918_v8 }
   0xd   :  { %v435_v59 = vadd.s32 64, %v428_v56  ;;  %v423_v1 = vmul.u32 8, %v951_v22  ;;  %v416_v2 = vadd.s32 %v409_v62, %v913_v7  ;;  %v72_v13 = vlaneseq }
   0xe   :  { %96 = vperm.xlu1 %780, %v913_v7   ;;  %93 = vperm.xlu0 %779, %v918_v8   ;;  %v436_v63 = vadd.s32 64, %v429_v61 }
   0xf   :  { %v430_v3 = vadd.s32 %v423_v1, %v946_v21 }
  0x11   :  { %v437_v5 = vadd.s32 64, %v430_v3 }
  0x12   :  { %118 = vperm.xlu1 %780, %v107_v11   ;;  %115 = vperm.xlu0 %779, %v106_v12  }
  0x16   :  { %124 = vperm.xlu1 %780, %v109_v15   ;;  %121 = vperm.xlu0 %779, %v108_v16   ;;  %v1037_v16 = vand.u32 127, %v72_v13 }
  0x18   :  { %vm242_vm6 = vcmp.lt.s32.totalorder %v1037_v16, 8 }
  0x1a   :  { %130 = vperm.xlu1 %780, %v111_v19   ;;  %127 = vperm.xlu0 %779, %v110_v20   ;;  %v1045_v19 = vld [vmem:[%s1371_s8] ss:$0 sm:$0xff]  ;;  %v820_v20 = vmov 0.0  }
  0x1e   :  { %136 = vperm.xlu1 %780, %v113_v23   ;;  %133 = vperm.xlu0 %779, %v112_v24  }
  0x22   :  { %185 = vperm.xlu1 %780, %v958_v25   ;;  %180 = vperm.xlu0 %779, %v963_v26  }
  0x26   :  { %195 = vperm.xlu1 %780, %v984_v30   ;;  %190 = vperm.xlu0 %779, %v989_v31  }
  0x2a   :  { %205 = vperm.xlu1 %780, %v996_v36   ;;  %200 = vperm.xlu0 %779, %v1001_v37  }
  0x2e   :  { %442 = vperm.xlu1 %780, %v411_v39   ;;  %439 = vperm.xlu0 %779, %v410_v38  }
  0x32   :  { %470 = vperm.xlu1 %780, %v432_v44   ;;  %467 = vperm.xlu0 %779, %v431_v45  }
  0x36   :  { %473 = vperm.xlu1 %780, %v433_v49   ;;  %445 = vperm.xlu0 %779, %v412_v50  }
  0x3a   :  { %476 = vperm.xlu1 %780, %v434_v54   ;;  %448 = vperm.xlu0 %779, %v413_v55  }
  0x3e   :  { %479 = vperm.xlu1 %780, %v435_v59   ;;  %451 = vperm.xlu0 %779, %v414_v60  }
  0x42   :  { %482 = vperm.xlu1 %780, %v436_v63   ;;  %454 = vperm.xlu0 %779, %v415_v0  }
  0x46   :  { %457 = vperm.xlu1 %780, %v416_v2   ;;  %210 = vperm.xlu0 %779, %v1024_v4  }
  0x4a   :  { %215 = vperm.xlu1 %780, %v1030_v6   ;;  %485 = vperm.xlu0 %779, %v437_v5  }
  0x7d   :  { %v82_v7 = vpop.permute.xlu1 %81  ;;  %v76_v8 = vpop.permute.xlu0 %75 }
  0x7e   :  { %vm98_vm3 = vcmp.eq.s32.totalorder %v1037_v16, %v76_v8  ;;  %vm100_vm11 = vcmp.eq.s32.totalorder %v1037_v16, %v82_v7 }
  0x81   :  { %v85_v9 = vpop.permute.xlu1 %84  ;;  %v79_v10 = vpop.permute.xlu0 %78 }
  0x82   :  { %vm99_vm0 = vcmp.eq.s32.totalorder %v1037_v16, %v79_v10  ;;  %vm101_vm8 = vcmp.eq.s32.totalorder %v1037_v16, %v85_v9 }
  0x85   :  { %v91_v11 = vpop.permute.xlu1 %90  ;;  %v88_v12 = vpop.permute.xlu0 %87 }
  0x86   :  { %vm102_vm15 = vcmp.eq.s32.totalorder %v1037_v16, %v88_v12 }
  0x89   :  { %v1033_v14 = vpop.permute.xlu1 %96  ;;  %v1035_v15 = vpop.permute.xlu0 %93 }
  0x8d   :  { %v119_v17 = vpop.permute.xlu1 %118  ;;  %v116_v18 = vpop.permute.xlu0 %115 }
  0x8e   :  { %vm139_vm1 = vcmp.eq.s32.totalorder %v1037_v16, %v119_v17  ;;  %vm138_vm2 = vcmp.eq.s32.totalorder %v1037_v16, %v116_v18 }
  0x8f   :  { %vm147_vm4 = vmor %vm99_vm0, %vm139_vm1 }
  0x90   :  { %v1049_v21 = vsel %vm147_vm4, 1.0, %v820_v20  ;;  %vm146_vm5 = vmor %vm98_vm3, %vm138_vm2  ;;  %vm103_vm2 = vcmp.eq.s32.totalorder %v1037_v16, %v91_v11 }
  0x91   :  { %v1053_v22 = vsel %vm146_vm5, 1.0, %v820_v20  ;;  %v125_v23 = vpop.permute.xlu1 %124  ;;  %v122_v24 = vpop.permute.xlu0 %121  ;;  %v273_v32 = vmul.f32 %v1045_v19, %v1049_v21  ;;  %vm104_vm5 = vcmp.eq.s32.totalorder %v1037_v16, %v1035_v15 }
  0x92   :  { %vm141_vm9 = vcmp.eq.s32.totalorder %v1037_v16, %v125_v23  ;;  %vm140_vm10 = vcmp.eq.s32.totalorder %v1037_v16, %v122_v24  ;;  %v272_v33 = vmul.f32 %v1045_v19, %v1053_v22  ;;  %v35_v23 = vld [vmem:[%s1369_s1 + $0x8] sm:$0xff] }
  0x93   :  { %vm149_vm12 = vmor %vm101_vm8, %vm141_vm9  ;;  %v281_v34 = vsel %vm242_vm6, %v273_v32, 0.0  ;;  %v313_v45 = vsel %vm242_vm6, 0.0, %v273_v32 }
  0x94   :  { %vm148_vm13 = vmor %vm100_vm11, %vm140_vm10  ;;  %v280_v35 = vsel %vm242_vm6, %v272_v33, 0.0  ;;  %v291_v38 = vsel %vm226_vm7, %v281_v34, 0.0  ;;  %v312_v43 = vsel %vm242_vm6, 0.0, %v272_v33  ;;  %v1075_v44 = vsel %vm149_vm12, 1.0, %v820_v20 }
  0x95   :  { %v1069_v39 = vsel %vm148_vm13, 1.0, %v820_v20  ;;  %v131_v40 = vpop.permute.xlu1 %130  ;;  %v288_v41 = vsel %vm226_vm7, %v280_v35, 0.0  ;;  %v128_v42 = vpop.permute.xlu0 %127  ;;  %292 = vadd.xlane.f32.xlu0 %v291_v38  ;;  %v320_v47 = vsel %vm226_vm7, %v312_v43, 0.0  ;;  %v323_v49 = vsel %vm226_vm7, %v313_v45, 0.0 }
  0x96   :  { %289 = vadd.xlane.f32.xlu1 %v288_v41  ;;  %vm142_vm14 = vcmp.eq.s32.totalorder %v1037_v16, %v128_v42  ;;  %v274_v46 = vmul.f32 %v1045_v19, %v1069_v39  ;;  %vm143_vm0 = vcmp.eq.s32.totalorder %v1037_v16, %v131_v40  ;;  %v275_v52 = vmul.f32 %v1045_v19, %v1075_v44  ;;  %v36_v42 = vld [vmem:[%s1369_s1 + $0x10] sm:$0xff] }
  0x97   :  { %vm150_vm1 = vmor %vm102_vm15, %vm142_vm14  ;;  %vm105_vm10 = vcmp.eq.s32.totalorder %v1037_v16, %v1033_v14  ;;  %v257_v14 = vmul.f32 %v968_v27, %v1053_v22  ;;  %v171_v40 = vmul.f32 %v1049_v21, %v35_v23  ;;  %v170_v43 = vmul.f32 %v1053_v22, %v973_v28 }
  0x98   :  { %v282_v51 = vsel %vm242_vm6, %v274_v46, 0.0  ;;  %v1092_v53 = vsel %vm150_vm1, 1.0, %v820_v20  ;;  %v314_v54 = vsel %vm242_vm6, 0.0, %v274_v46  ;;  %vm151_vm3 = vmor %vm103_vm2, %vm143_vm0  ;;  %v283_v59 = vsel %vm242_vm6, %v275_v52, 0.0 }
  0x99   :  { %v137_v48 = vpop.permute.xlu1 %136  ;;  %v134_v50 = vpop.permute.xlu0 %133  ;;  %321 = vadd.xlane.f32.xlu0 %v320_v47  ;;  %v294_v55 = vsel %vm226_vm7, %v282_v51, 0.0  ;;  %v326_v57 = vsel %vm226_vm7, %v314_v54, 0.0  ;;  %v276_v60 = vmul.f32 %v1045_v19, %v1092_v53  ;;  %v1108_v61 = vsel %vm151_vm3, 1.0, %v820_v20 }
  0x9a   :  { %324 = vadd.xlane.f32.xlu1 %v323_v49  ;;  %vm144_vm4 = vcmp.eq.s32.totalorder %v1037_v16, %v134_v50  ;;  %v315_v62 = vsel %vm242_vm6, 0.0, %v275_v52  ;;  %v297_v63 = vsel %vm226_vm7, %v283_v59, 0.0  ;;  %v277_v5 = vmul.f32 %v1045_v19, %v1108_v61 }
  0x9b   :  { %vm152_vm8 = vmor %vm104_vm5, %vm144_vm4  ;;  %v329_v1 = vsel %vm226_vm7, %v315_v62, 0.0  ;;  %v284_v3 = vsel %vm242_vm6, %v276_v60, 0.0  ;;  %v316_v8 = vsel %vm242_vm6, 0.0, %v276_v60  ;;  %vm145_vm9 = vcmp.eq.s32.totalorder %v1037_v16, %v137_v48 }
  0x9c   :  { %v1123_v7 = vsel %vm152_vm8, 1.0, %v820_v20  ;;  %v300_v9 = vsel %vm226_vm7, %v284_v3, 0.0  ;;  %v332_v11 = vsel %vm226_vm7, %v316_v8, 0.0  ;;  %v285_v13 = vsel %vm242_vm6, %v277_v5, 0.0  ;;  %vm153_vm11 = vmor %vm105_vm10, %vm145_vm9 }
  0x9d   :  { %v1098_v56 = vpop.permute.xlu1 %185  ;;  %v181_v58 = vpop.permute.xlu0 %180  ;;  %295 = vadd.xlane.f32.xlu0 %v294_v55  ;;  %v278_v15 = vmul.f32 %v1045_v19, %v1123_v7  ;;  %v317_v17 = vsel %vm242_vm6, 0.0, %v277_v5  ;;  %v303_v18 = vsel %vm226_vm7, %v285_v13, 0.0  ;;  %v1152_v35 = vsel %vm153_vm11, 1.0, %v820_v20 }
  0x9e   :  { %327 = vadd.xlane.f32.xlu1 %v326_v57  ;;  %v335_v32 = vsel %vm226_vm7, %v317_v17, 0.0  ;;  %v262_v47 = vsel %vm242_vm6, 0.0, %v257_v14  ;;  %v279_v21 = vmul.f32 %v1045_v19, %v1152_v35  ;;  %v258_v48 = vsel %vm242_vm6, %v257_v14, 0.0 }
  0x9f   :  { %v286_v34 = vsel %vm242_vm6, %v278_v15, 0.0  ;;  %v318_v38 = vsel %vm242_vm6, 0.0, %v278_v15  ;;  %v219_v49 = vmul.f32 %v1098_v56, %v171_v40  ;;  %v218_v50 = vmul.f32 %v181_v58, %v170_v43  ;;  %v37_v58 = vld [vmem:[%s1369_s1 + $0x18] sm:$0xff] }
  0xa0   :  { %v306_v41 = vsel %vm226_vm7, %v286_v34, 0.0  ;;  %v338_v27 = vsel %vm226_vm7, %v318_v38, 0.0  ;;  %v172_v28 = vmul.f32 %v1069_v39, %v36_v42  ;;  %v263_v22 = vsel %vm226_vm7, %v262_v47, 0.0 }
  0xa1   :  { %v1113_v0 = vpop.permute.xlu1 %195  ;;  %v1116_v2 = vpop.permute.xlu0 %190  ;;  %298 = vadd.xlane.f32.xlu0 %v297_v63  ;;  %v259_v52 = vsel %vm226_vm7, %v258_v48, 0.0  ;;  %v319_v55 = vsel %vm242_vm6, 0.0, %v279_v21  ;;  %v287_v39 = vsel %vm242_vm6, %v279_v21, 0.0  ;;  %v228_v59 = vsel %vm226_vm7, %v219_v49, 0.0 }
  0xa2   :  { %330 = vadd.xlane.f32.xlu1 %v329_v1  ;;  %v220_v57 = vmul.f32 %v1116_v2, %v172_v28  ;;  %v227_v60 = vsel %vm226_vm7, %v218_v50, 0.0  ;;  %v341_v63 = vsel %vm226_vm7, %v319_v55, 0.0  ;;  %v38_v1 = vld [vmem:[%s1369_s1 + $0x20] sm:$0xff]  ;;  %v309_v8 = vsel %vm226_vm7, %v287_v39, 0.0  ;;  %v41_v55 = vld [vmem:[%s1369_s1 + $0x38] sm:$0xff] }
  0xa3   :  { %v229_v15 = vadd.f32 %v228_v59, %v227_v60  ;;  %v174_v17 = vmul.f32 %v1092_v53, %v38_v1  ;;  %v39_v53 = vld [vmem:[%s1369_s1 + $0x28] sm:$0xff] }
  0xa4   :  { %v230_v13 = vsel %vm226_vm7, %v220_v57, 0.0 }
  0xa5   :  { %v1129_v10 = vpop.permute.xlu1 %205  ;;  %v1132_v12 = vpop.permute.xlu0 %200  ;;  %301 = vadd.xlane.f32.xlu0 %v300_v9 }
  0xa6   :  { %333 = vadd.xlane.f32.xlu1 %v332_v11  ;;  %v173_v11 = vmul.f32 %v1075_v44, %v37_v58  ;;  %v735_v44 = vld [vmem:[%s1372_s9] ss:$0 sm:$0xff]  ;;  %v222_v14 = vmul.f32 %v1132_v12, %v174_v17 }
  0xa8   :  { %v234_v49 = vsel %vm226_vm7, %v222_v14, 0.0 }
  0xa9   :  { %v443_v24 = vpop.permute.xlu1 %442  ;;  %304 = vadd.xlane.f32.xlu0 %v303_v18  ;;  %v440_v33 = vpop.permute.xlu0 %439  ;;  %v221_v18 = vmul.f32 %v1113_v0, %v173_v11 }
  0xaa   :  { %336 = vadd.xlane.f32.xlu1 %v335_v32  ;;  %vm460_vm14 = vcmp.eq.s32.totalorder %v1037_v16, %v443_v24  ;;  %vm459_vm15 = vcmp.eq.s32.totalorder %v1037_v16, %v440_v33  ;;  %v231_v32 = vadd.f32 %v230_v13, %v229_v15 }
  0xab   :  { %v232_v42 = vsel %vm226_vm7, %v221_v18, 0.0 }
  0xad   :  { %v471_v45 = vpop.permute.xlu1 %470  ;;  %307 = vadd.xlane.f32.xlu0 %v306_v41  ;;  %v468_v46 = vpop.permute.xlu0 %467 }
  0xae   :  { %339 = vadd.xlane.f32.xlu1 %v338_v27  ;;  %vm488_vm12 = vcmp.eq.s32.totalorder %v1037_v16, %v471_v45  ;;  %vm487_vm13 = vcmp.eq.s32.totalorder %v1037_v16, %v468_v46  ;;  %v175_v45 = vmul.f32 %v1108_v61, %v39_v53  ;;  %v40_v27 = vld [vmem:[%s1369_s1 + $0x30] sm:$0xff]  ;;  %v233_v46 = vadd.f32 %v232_v42, %v231_v32  ;;  %v1274_v42 = vld [vmem:[%s1375_s6] sm:$0xff] }
  0xaf   :  { %vm1190_vm0 = vmor %vm460_vm14, %vm488_vm12 }
  0xb0   :  { %vm1200_vm3 = vmor %vm459_vm15, %vm487_vm13  ;;  %v729_v23 = vsel %vm1190_vm0, 1.0, %v820_v20  ;;  %v235_v57 = vadd.f32 %v234_v49, %v233_v46 }
  0xb1   :  { %v474_v51 = vpop.permute.xlu1 %473  ;;  %264 = vadd.xlane.f32.xlu0 %v263_v22  ;;  %v446_v54 = vpop.permute.xlu0 %445  ;;  %v728_v24 = vsel %vm1200_vm3, 1.0, %v820_v20  ;;  %v522_v40 = vmul.f32 %v735_v44, %v729_v23  ;;  %vm541_vm3 = vcmp.lt.s32.totalorder %v1037_v16, 64 }
  0xb2   :  { %260 = vadd.xlane.f32.xlu1 %v259_v52  ;;  %vm489_vm1 = vcmp.eq.s32.totalorder %v1037_v16, %v474_v51  ;;  %vm461_vm2 = vcmp.eq.s32.totalorder %v1037_v16, %v446_v54  ;;  %v521_v41 = vmul.f32 %v735_v44, %v728_v24  ;;  %v176_v51 = vmul.f32 %v1123_v7, %v40_v27 }
  0xb3   :  { %vm496_vm8 = vmor %vm461_vm2, %vm489_vm1  ;;  %v529_v28 = vmul.f32 %v522_v40, %v1116_v2  ;;  %v223_v52 = vmul.f32 %v1129_v10, %v175_v45  ;;  %v177_v7 = vmul.f32 %v1152_v35, %v41_v55 }
  0xb4   :  { %v730_v38 = vsel %vm496_vm8, 1.0, %v820_v20  ;;  %v528_v61 = vmul.f32 %v521_v41, %v1098_v56  ;;  %v1269_v41 = vld [vmem:[%s1374_s5] sm:$0xff] }
  0xb5   :  { %v477_v5 = vpop.permute.xlu1 %476  ;;  %342 = vadd.xlane.f32.xlu0 %v341_v63  ;;  %v449_v9 = vpop.permute.xlu0 %448  ;;  %v523_v47 = vmul.f32 %v735_v44, %v730_v38  ;;  %v236_v1 = vsel %vm226_vm7, %v223_v52, 0.0 }
  0xb6   :  { %vm490_vm4 = vcmp.eq.s32.totalorder %v1037_v16, %v477_v5  ;;  %310 = vadd.xlane.f32.xlu1 %v309_v8  ;;  %vm462_vm5 = vcmp.eq.s32.totalorder %v1037_v16, %v449_v9  ;;  %v535_v56 = vadd.f32 %v529_v28, %v528_v61  ;;  %v237_v9 = vadd.f32 %v236_v1, %v235_v57 }
  0xb7   :  { %vm497_vm9 = vmor %vm462_vm5, %vm490_vm4  ;;  %v530_v39 = vmul.f32 %v523_v47, %v1113_v0  ;;  %v347_v57 = vsub.f32 1.0, %v1001_v37  ;;  %vm365_vm4 = vcmask 7168  }
  0xb8   :  { %v731_v43 = vsel %vm497_vm9, 1.0, %v820_v20 }
  0xb9   :  { %v480_v33 = vpop.permute.xlu1 %479  ;;  %v452_v34 = vpop.permute.xlu0 %451  ;;  %v524_v22 = vmul.f32 %v735_v44, %v731_v43  ;;  %v536_v5 = vadd.f32 %v535_v56, %v530_v39  ;;  %v1279_v43 = vld [vmem:[%s1375_s6 + $0x8] sm:$0xff]  ;;  %v349_v56 = vsub.f32 1.0, %v1024_v4 }
  0xba   :  { %vm491_vm10 = vcmp.eq.s32.totalorder %v1037_v16, %v480_v33  ;;  %vm463_vm11 = vcmp.eq.s32.totalorder %v1037_v16, %v452_v34 }
  0xbb   :  { %vm498_vm12 = vmor %vm463_vm11, %vm491_vm10  ;;  %v531_v62 = vmul.f32 %v524_v22, %v1132_v12  ;;  %v344_v22 = vsub.f32 1.0, %v958_v25 }
  0xbc   :  { %v732_v50 = vsel %vm498_vm12, 1.0, %v820_v20 }
  0xbd   :  { %v483_v21 = vpop.permute.xlu1 %482  ;;  %v455_v48 = vpop.permute.xlu0 %454  ;;  %v525_v58 = vmul.f32 %v735_v44, %v732_v50  ;;  %v537_v15 = vadd.f32 %v536_v5, %v531_v62  ;;  %v351_v39 = vmul.f32 %v344_v22, %v963_v26  ;;  %v350_v26 = vsub.f32 1.0, %v1030_v6 }
  0xbe   :  { %vm492_vm13 = vcmp.eq.s32.totalorder %v1037_v16, %v483_v21  ;;  %vm464_vm14 = vcmp.eq.s32.totalorder %v1037_v16, %v455_v48 }
  0xbf   :  { %vm499_vm15 = vmor %vm464_vm14, %vm492_vm13  ;;  %v532_v8 = vmul.f32 %v525_v58, %v1129_v10 }
  0xc0   :  { %v733_v54 = vsel %vm499_vm15, 1.0, %v820_v20 }
  0xc1   :  { %v458_v59 = vpop.permute.xlu1 %457  ;;  %v211_v2 = vpop.permute.xlu0 %210  ;;  %v526_v63 = vmul.f32 %v735_v44, %v733_v54  ;;  %v538_v23 = vadd.f32 %v537_v15, %v532_v8  ;;  %v346_v54 = vsub.f32 1.0, %v984_v30 }
  0xc2   :  { %v224_v60 = vmul.f32 %v211_v2, %v176_v51  ;;  %vm465_vm0 = vcmp.eq.s32.totalorder %v1037_v16, %v458_v59  ;;  %v345_v51 = vsub.f32 1.0, %v989_v31  ;;  %v348_v59 = vsub.f32 1.0, %v996_v36 }
  0xc3   :  { %v533_v17 = vmul.f32 %v526_v63, %v211_v2  ;;  %v353_v2 = vmul.f32 %v346_v54, %v989_v31  ;;  %v356_v31 = vmul.f32 %v349_v56, %v996_v36 }
  0xc4   :  { %v238_v3 = vsel %vm226_vm7, %v224_v60, 0.0  ;;  %v352_v58 = vmul.f32 %v345_v51, %v958_v25  ;;  %v355_v5 = vmul.f32 %v348_v59, %v1001_v37 }
  0xc5   :  { %v216_v11 = vpop.permute.xlu1 %215  ;;  %v486_v0 = vpop.permute.xlu0 %485  ;;  %v239_v12 = vadd.f32 %v238_v3, %v237_v9  ;;  %v539_v10 = vadd.f32 %v538_v23, %v533_v17 }
  0xc6   :  { %v225_v13 = vmul.f32 %v216_v11, %v177_v7  ;;  %vm493_vm1 = vcmp.eq.s32.totalorder %v1037_v16, %v486_v0  ;;  %v354_v7 = vmul.f32 %v347_v57, %v984_v30 }
  0xc7   :  { %vm500_vm2 = vmor %vm465_vm0, %vm493_vm1 }
  0xc8   :  { %v240_v35 = vsel %vm226_vm7, %v225_v13, 0.0  ;;  %v734_v18 = vsel %vm500_vm2, 1.0, %v820_v20 }
  0xc9   :  { %v527_v24 = vmul.f32 %v735_v44, %v734_v18  ;;  %v241_v32 = vadd.f32 %v240_v35, %v239_v12  ;;  %v357_v12 = vmul.f32 %v350_v26, %v1024_v4 }
  0xcb   :  { %v243_v33 = vsel %vm242_vm6, %v241_v32, 0.0  ;;  %v534_v34 = vmul.f32 %v527_v24, %v216_v11  ;;  %v247_v38 = vsel %vm242_vm6, 0.0, %v241_v32 }
  0xcc   :  { %v244_v53 = vsel %vm226_vm7, %v243_v33, 0.0  ;;  %v248_v20 = vsel %vm226_vm7, %v247_v38, 0.0 }
  0xcd   :  { %245 = vadd.xlane.f32.xlu0 %v244_v53  ;;  %v540_v14 = vadd.f32 %v539_v10, %v534_v34 }
  0xcf   :  { %v542_v40 = vsel %vm541_vm3, %v540_v14, 0.0  ;;  %v545_v44 = vsel %vm541_vm3, 0.0, %v540_v14 }
  0xd0   :  { %543 = vadd.xlane.f32.xlu1 %v542_v40 }
  0xd1   :  { %249 = vadd.xlane.f32.xlu0 %v248_v20 }
  0xd5   :  { %546 = vadd.xlane.f32.xlu0 %v545_v44 }
 0x11e   :  { %v293_v45 = vpop.xlane.xlu0 %292 }
 0x11f   :  { %v290_v27 = vpop.xlane.xlu1 %289  ;;  %v359_v63 = vmul.f32 %v352_v58, %v293_v45 }
 0x120   :  { %v358_v62 = vmul.f32 %v351_v39, %v290_v27 }
 0x121   :  { %v367_v8 = vsel %vm365_vm4, %v359_v63, 0.0 }
 0x122   :  { %v322_v46 = vpop.xlane.xlu0 %321  ;;  %v366_v25 = vsel %vm365_vm4, %v358_v62, 0.0 }
 0x123   :  { %v325_v47 = vpop.xlane.xlu1 %324  ;;  %v381_v0 = vmul.f32 %v351_v39, %v322_v46  ;;  %v368_v35 = vadd.f32 %v367_v8, %v366_v25  ;;  %v815_v25 = vmov %v977_v29  }
 0x124   :  { %v382_v11 = vmul.f32 %v352_v58, %v325_v47 }
 0x125   :  { %v388_v32 = vsel %vm365_vm4, %v381_v0, 0.0 }
 0x126   :  { %v296_v21 = vpop.xlane.xlu0 %295  ;;  %v389_v24 = vsel %vm365_vm4, %v382_v11, 0.0 }
 0x127   :  { %v328_v48 = vpop.xlane.xlu1 %327  ;;  %v360_v3 = vmul.f32 %v353_v2, %v296_v21  ;;  %v390_v40 = vadd.f32 %v389_v24, %v388_v32 }
 0x128   :  { %v383_v37 = vmul.f32 %v353_v2, %v328_v48 }
 0x129   :  { %v369_v15 = vsel %vm365_vm4, %v360_v3, 0.0 }
 0x12a   :  { %v299_v49 = vpop.xlane.xlu0 %298  ;;  %v370_v10 = vadd.f32 %v369_v15, %v368_v35  ;;  %v391_v53 = vsel %vm365_vm4, %v383_v37, 0.0 }
 0x12b   :  { %v331_v50 = vpop.xlane.xlu1 %330  ;;  %v361_v9 = vmul.f32 %v354_v7, %v299_v49  ;;  %v392_v47 = vadd.f32 %v391_v53, %v390_v40 }
 0x12c   :  { %v384_v36 = vmul.f32 %v354_v7, %v331_v50 }
 0x12d   :  { %v371_v18 = vsel %vm365_vm4, %v361_v9, 0.0 }
 0x12e   :  { %v302_v28 = vpop.xlane.xlu0 %301  ;;  %v372_v14 = vadd.f32 %v371_v18, %v370_v10  ;;  %v393_v45 = vsel %vm365_vm4, %v384_v36, 0.0 }
 0x12f   :  { %v334_v61 = vpop.xlane.xlu1 %333  ;;  %v362_v30 = vmul.f32 %v355_v5, %v302_v28 }
 0x130   :  { %v385_v38 = vmul.f32 %v355_v5, %v334_v61  ;;  %v394_v61 = vadd.f32 %v393_v45, %v392_v47 }
 0x131   :  { %v373_v33 = vsel %vm365_vm4, %v362_v30, 0.0 }
 0x132   :  { %v305_v52 = vpop.xlane.xlu0 %304  ;;  %v374_v27 = vadd.f32 %v373_v33, %v372_v14  ;;  %v395_v48 = vsel %vm365_vm4, %v385_v38, 0.0 }
 0x133   :  { %v337_v55 = vpop.xlane.xlu1 %336  ;;  %v363_v23 = vmul.f32 %v356_v31, %v305_v52  ;;  %v396_v57 = vadd.f32 %v395_v48, %v394_v61 }
 0x134   :  { %v386_v46 = vmul.f32 %v356_v31, %v337_v55 }
 0x135   :  { %v375_v20 = vsel %vm365_vm4, %v363_v23, 0.0 }
 0x136   :  { %v308_v60 = vpop.xlane.xlu0 %307  ;;  %v376_v49 = vadd.f32 %v375_v20, %v374_v27  ;;  %v397_v52 = vsel %vm365_vm4, %v386_v46, 0.0 }
 0x137   :  { %v340_v1 = vpop.xlane.xlu1 %339  ;;  %v364_v34 = vmul.f32 %v357_v12, %v308_v60  ;;  %v398_v60 = vadd.f32 %v397_v52, %v396_v57 }
 0x138   :  { %v387_v50 = vmul.f32 %v357_v12, %v340_v1 }
 0x139   :  { %v377_v21 = vsel %vm365_vm4, %v364_v34, 0.0 }
 0x13a   :  { %v265_v13 = vpop.xlane.xlu0 %264  ;;  %v378_v54 = vadd.f32 %v377_v21, %v376_v49  ;;  %v399_v58 = vsel %vm365_vm4, %v387_v50, 0.0 }
 0x13b   :  { %v261_v17 = vpop.xlane.xlu1 %260  ;;  %v400_v63 = vadd.f32 %v399_v58, %v398_v60 }
 0x13e   :  { %v343_v4 = vpop.xlane.xlu0 %342 }
 0x13f   :  { %v311_v44 = vpop.xlane.xlu1 %310  ;;  %v401_v56 = vmul.f32 %v343_v4, %v1030_v6 }
 0x140   :  { %v379_v28 = vmul.f32 %v311_v44, %v1030_v6 }
 0x141   :  { %v402_v3 = vadd.f32 %v401_v56, %v400_v63 }
 0x142   :  { %v380_v55 = vadd.f32 %v379_v28, %v378_v54 }
 0x156   :  { %v246_v22 = vpop.xlane.xlu0 %245 }
 0x157   :  { %v548_v51 = vadd.f32 %v261_v17, %v246_v22 }
 0x159   :  { %v544_v39 = vpop.xlane.xlu1 %543 }
 0x15a   :  { %v549_v59 = vadd.f32 %v548_v51, %v544_v39  ;;  %v250_v2 = vpop.xlane.xlu0 %249 }
 0x15b   :  { %v551_v7 = vadd.f32 %v265_v13, %v250_v2 }
 0x15c   :  { %v1311_v62 = vadd.f32 %v549_v59, %v380_v55 }
 0x15d   :  { %713 = sbr.rel (%p736_p0) target bundleno = 735 (0x2df), region = 58 }
 0x15e   :  { %v547_v1 = vpop.xlane.xlu0 %546 }
 0x15f   :  { %v552_v5 = vadd.f32 %v551_v7, %v547_v1 }
 0x161   :  { %v1313_v26 = vadd.f32 %v552_v5, %v402_v3 }
 0x162   :  { %v807_v8 = vmov %v977_v29  }
 0x163 LB: > { %v568_v6 = vsel %vm242_vm6, %v809_v8, -1e+09  ;;  %v572_v9 = vsel %vm242_vm6, -1e+09, %v809_v8  ;;  %v821_v11 = vmov 0.0   ;;  %vm822_vm5 = vmmov 0   ;;  %s813_s19 = sphi %s1320_s19, %s559_s19   ;;  %v809_v8 = vphi %v807_v8, %v808_v8  }
 0x164   : > { %v569_v31 = vsel %vm226_vm7, %v568_v6, -inf  ;;  %v573_v29 = vsel %vm226_vm7, %v572_v9, -inf  ;;  %742 = vmatprep.subr.mxu0 %v821_v11  ;;  %746 = vmatprep.mubr.msk.f32.mxu0 %vm822_vm5, %v821_v11  ;;  %v823_v0 = vmov 0   ;;  %v658_v13 = vstv %s813_s19  ;;  %s737_s20 = sshll.u32 %s813_s19, 3  ;;  %s559_s19 = sadd.s32 1, %s813_s19  }
 0x165   : > { %570 = vmax.xlane.f32.xlu0 %v569_v31  ;;  %743 = vmatpush3.msra.mxu0 %v1279_v43  ;;  %vm659_vm8 = vcmp.lt.s32.totalorder %v658_v13, %v1269_v41  ;;  %s564_s8 = scalar_lea.vmem %s1369_s1, %s737_s20  ;;  %p558_p1 = scmp.ge.s32.totalorder %s559_s19, %s1373_s0 }
 0x166   : > { %744 = vmatprep.subr.mxu0 %v821_v11  ;;  %781 = vset.pattern.permute.xlu1 %v823_v0  ;;  %v660_v15 = vsel %vm659_vm8, 1, %v823_v0  ;;  %v565_v34 = vld [vmem:[%s564_s8] sm:$0xff] }
 0x167   : > { %745 = vmatpush3.msra.mxu0 %v1274_v42  ;;  %782 = vset.pattern.permute.xlu0 %v823_v0 }
 0x168   : > { %662 = vperm.xlu1 %781, %v660_v15  }
 0x169   : > { %574 = vmax.xlane.f32.xlu0 %v573_v29 }
 0x1e3   : > { %v663_v33 = vpop.permute.xlu1 %662 }
 0x1e4   : > { %vm664_vm9 = vcmp.eq.s32.totalorder %v663_v33, 1 }
 0x1ee   : > { %v571_v30 = vpop.xlane.xlu0 %570 }
 0x1f2   : > { %v575_v12 = vpop.xlane.xlu0 %574 }
 0x1f3   : > { %v576_v17 = vsel %vm242_vm6, %v571_v30, %v575_v12 }
 0x1f4   : > { %v577_v35 = vsub.f32 %v809_v8, %v576_v17 }
 0x1f6   : > { %v578_v37 = vmul.f32 1.442695, %v577_v35 }
 0x1f8   : > { %783 = vpow2.f32 %v578_v37 }
 0x205   : > { %v784_v18 = vpop.eup %783 }
 0x206   : > { %747 = vmatmul.mubr.msk.f32.vlgmr.msra.gmra.mxu0 %vm226_vm7, %v784_v18 }
 0x2c6   : > { %v649_v23 = vpop.f32.mrf.mxu0 }
 0x2c7   : > { %v653_v24 = vmax.f32 %v649_v23, 1e-30 }
 0x2c8   : > { %v748_v32 = vpop.f32.mrf.mxu0 }
 0x2c9   : > { %785 = vlog2.f32 %v653_v24 }
 0x2d6   : > { %v786_v10 = vpop.eup %785 }
 0x2d7   : > { %v655_v36 = vmul.f32 0.6931472, %v786_v10 }
 0x2d9   : > { %v656_v53 = vadd.f32 %v655_v36, %v576_v17 }
 0x2da   :  { %561 = sbr.rel (!%p558_p1) target bundleno = 355 (0x163), region = 64 }
 0x2db   : > { %v657_v14 = vadd.f32 %v656_v53, %v565_v34 }
 0x2dd   : > { %v665_v38 = vsel %vm664_vm9, %v657_v14, %v809_v8  }
 0x2de   : > { %v808_v8 = vmov %v665_v38   ;;  %v816_v25 = vmov (%p558_p1), %v665_v38  }
 0x2df PF:  { %v666_v4 = vadd.f32 %v817_v25, %v1045_v19  ;;  %s824_s0 = smov 1   ;;  %v817_v25 = vphi %v815_v25, %v816_v25  }
 0x2e1   :  { %v673_v40 = vsel %vm242_vm6, -1e+09, %v666_v4  ;;  %v669_v20 = vsel %vm242_vm6, %v666_v4, -1e+09  ;;  %vm702_vm6 = vcmask 15368  }
 0x2e2   :  { %v674_v44 = vsel %vm226_vm7, %v673_v40, -inf  ;;  %v670_v45 = vsel %vm226_vm7, %v669_v20, -inf }
 0x2e3   :  { %675 = vmax.xlane.f32.xlu0 %v674_v44 }
 0x2e7   :  { %671 = vmax.xlane.f32.xlu0 %v670_v45 }
 0x36c   :  { %v676_v27 = vpop.xlane.xlu0 %675 }
 0x36d   :  { %v680_v46 = vsub.f32 %v673_v40, %v676_v27 }
 0x36f   :  { %v681_v41 = vmul.f32 1.442695, %v680_v46 }
 0x370   :  { %v672_v42 = vpop.xlane.xlu0 %671 }
 0x371   :  { %787 = vpow2.f32 %v681_v41  ;;  %v677_v43 = vsub.f32 %v669_v20, %v672_v42 }
 0x373   :  { %v678_v47 = vmul.f32 1.442695, %v677_v43 }
 0x375   :  { %789 = vpow2.f32 %v678_v47 }
 0x37e   :  { %v788_v19 = vpop.eup %787 }
 0x37f   :  { %v689_v21 = vsel %vm226_vm7, %v788_v19, 0.0 }
 0x380   :  { %690 = vadd.xlane.f32.xlu1 %v689_v21 }
 0x382   :  { %v790_v16 = vpop.eup %789 }
 0x383   :  { %v683_v48 = vsel %vm226_vm7, %v790_v16, 0.0 }
 0x384   :  { %684 = vadd.xlane.f32.xlu1 %v683_v48 }
 0x409   :  { %v691_v49 = vpop.xlane.xlu1 %690 }
 0x40a   :  { %791 = vlog2.f32 %v691_v49 }
 0x40d   :  { %v685_v50 = vpop.xlane.xlu1 %684 }
 0x40e   :  { %793 = vlog2.f32 %v685_v50 }
 0x417   :  { %v792_v28 = vpop.eup %791 }
 0x418   :  { %v693_v22 = vmul.f32 0.6931472, %v792_v28 }
 0x41a   :  { %v694_v61 = vadd.f32 %v693_v22, %v676_v27 }
 0x41b   :  { %v794_v51 = vpop.eup %793 }
 0x41c   :  { %v687_v52 = vmul.f32 0.6931472, %v794_v51  ;;  %v697_v54 = vsub.f32 %v1313_v26, %v694_v61 }
 0x41e   :  { %699 = vrot.lane.b32.xlu0 %v697_v54, %s824_s0  ;;  %v688_v57 = vadd.f32 %v687_v52, %v672_v42 }
 0x420   :  { %v695_v39 = vsub.f32 %v1311_v62, %v688_v57 }
 0x422   :  { %696 = vst.msk [vmem:[%s1376_s10] sm:$0xff] %vm365_vm4, %v695_v39 }
 0x490   :  { %v700_v58 = vpop.permute.xlu0 %699 }
 0x491   :  { %703 = vst.msk [vmem:[%s1376_s10] sm:$0xff] %vm702_vm6, %v700_v58 }

</bundles_post_ra>
